<compile_context>
chip_gen: v6e
topology: v6e:2x2x1
jax: 0.10.0
libtpu: 0.0.40
codegen_flags: <defaults>
</compile_context>

<pallas_src>
import functools

import jax
import jax.numpy as jnp
from jax.experimental import pallas as pl
from jax.experimental.pallas import tpu as pltpu


BATCH_PAD = 8  # pad batch to one full sublane group


# ----------------------------------------------------------------------------
# Fused Pallas kernel: 2-layer bidirectional LSTM + MLP head
# ----------------------------------------------------------------------------
def _fused_kernel(x_ref,
                  w_in0_ref, b_in0_ref, w_hh0_ref,
                  w_in1f_ref, w_hh1f_ref, b1f_ref,
                  w_in1b_ref, b1b_ref,
                  w1_ref, bf1_ref, w2_ref, bf2_ref, w3_ref, bf3_ref,
                  out_ref,
                  xp0_scr, h1_scr, xp1_scr,
                  *, seq_len, batch_pad, hidden):
    T, Bp, H = seq_len, batch_pad, hidden
    f32, bf16 = jnp.float32, jnp.bfloat16

    def dot(a, b):
        # bf16 operands, f32 accumulation (weights are already bf16)
        return jnp.dot(a.astype(bf16), b, preferred_element_type=f32)

    def sig(v):
        # sigmoid(x) = 0.5*tanh(0.5x) + 0.5 : one EUP push + 2 cheap VPU ops
        return 0.5 * jnp.tanh(0.5 * v) + 0.5

    # ------------------------------------------------------------------
    # Layer 1: ONE fused input projection for BOTH directions (bulk MXU pass)
    #   x @ [W_ih_fwd | W_ih_bwd] + [b_fwd | b_bwd]  ->  (T*Bp, 8H)
    # fwd gate pre-activations live in lanes [0,4H), bwd in [4H,8H).
    # ------------------------------------------------------------------
    xp0_scr[...] = dot(x_ref[...], w_in0_ref[...]) + b_in0_ref[...]

    # ------------------------------------------------------------------
    # Layer 1: interleaved fwd/bwd recurrence (fully unrolled, static slices).
    # One block-diagonal h@W_hh (2H x 8H) per step serves both directions.
    # ------------------------------------------------------------------
    w_hh0 = w_hh0_ref[...]                                   # (2H, 8H) bf16
    h_f = jnp.zeros((Bp, H), f32)
    c_f = jnp.zeros((Bp, H), f32)
    h_b = jnp.zeros((Bp, H), f32)
    c_b = jnp.zeros((Bp, H), f32)
    for s in range(T):
        tf, tb = s, T - 1 - s                                # static indices
        rf, rb = tf * Bp, tb * Bp
        h_pack = jnp.concatenate([h_f, h_b], axis=-1)        # (Bp, 2H)
        xg = jnp.concatenate(
            [xp0_scr[rf:rf + Bp, 0:4 * H],                   # fwd gates @ t=tf
             xp0_scr[rb:rb + Bp, 4 * H:8 * H]], axis=-1)     # bwd gates @ t=tb
        g = xg + dot(h_pack, w_hh0)                          # (Bp, 8H) f32
        sg = sig(g)                                          # full-width pass
        th = jnp.tanh(g)                                     # full-width pass
        # gate lanes per direction block: [i, f, g, o]
        c_f = sg[:, H:2 * H] * c_f + sg[:, 0:H] * th[:, 2 * H:3 * H]
        h_f = sg[:, 3 * H:4 * H] * jnp.tanh(c_f)
        c_b = sg[:, 5 * H:6 * H] * c_b + sg[:, 4 * H:5 * H] * th[:, 6 * H:7 * H]
        h_b = sg[:, 7 * H:8 * H] * jnp.tanh(c_b)
        # packed layer-1 output: fwd lanes 0:H, bwd lanes H:2H
        h1_scr[rf:rf + Bp, 0:H] = h_f
        h1_scr[rb:rb + Bp, H:2 * H] = h_b

    # ------------------------------------------------------------------
    # Layer 2, BACKWARD direction: exactly one step (valid ONLY because the
    # head consumes out[:, -1, :] and the backward init state is zero; its
    # W_hh never contributes).  Hoisted before the forward recurrence so it
    # hides under that serial chain.
    # ------------------------------------------------------------------
    h1_last = h1_scr[(T - 1) * Bp:T * Bp, :]                 # (Bp, 2H)
    g_b = dot(h1_last, w_in1b_ref[...]) + b1b_ref[...]       # (Bp, 4H)
    sgb = sig(g_b)
    c2b = sgb[:, 0:H] * jnp.tanh(g_b[:, 2 * H:3 * H])        # f*c_prev = 0
    h2b = sgb[:, 3 * H:4 * H] * jnp.tanh(c2b)                # (Bp, H)
    head_b = dot(h2b, w1_ref[H:2 * H, :])                    # (Bp, 64) hoisted

    # ------------------------------------------------------------------
    # Layer 2, FORWARD direction: bulk input projection (single matmul with the
    # packed (2H,4H) weight — no fwd/bwd concat needed) + serial recurrence.
    # Only the final h is needed, so no per-step stores.
    # ------------------------------------------------------------------
    xp1_scr[...] = dot(h1_scr[...], w_in1f_ref[...]) + b1f_ref[...]
    w_hh1f = w_hh1f_ref[...]                                 # (H, 4H) bf16
    h2 = jnp.zeros((Bp, H), f32)
    c2 = jnp.zeros((Bp, H), f32)
    for s in range(T):
        r = s * Bp
        g = xp1_scr[r:r + Bp, :] + dot(h2, w_hh1f)           # (Bp, 4H)
        sg = sig(g)
        th = jnp.tanh(g)
        c2 = sg[:, H:2 * H] * c2 + sg[:, 0:H] * th[:, 2 * H:3 * H]
        h2 = sg[:, 3 * H:4 * H] * jnp.tanh(c2)

    # ---- MLP head: Linear(2H,64)+ReLU -> [Dropout=id] -> Linear(64,32)+ReLU
    #      -> Linear(32,1).  The fwd/bwd concat is decomposed into two dots.
    a1 = jnp.maximum(dot(h2, w1_ref[0:H, :]) + head_b + bf1_ref[...], 0.0)
    a2 = jnp.maximum(dot(a1, w2_ref[...]) + bf2_ref[...], 0.0)
    out_ref[...] = (dot(a2, w3_ref[...]) + bf3_ref[...]).astype(out_ref.dtype)


# ----------------------------------------------------------------------------
# Wrapper: one pallas_call for the whole forward pass
# ----------------------------------------------------------------------------
def lstm_model_forward(x, params):
    """x: (B, T, input_size) -> (B, 1), matching LSTMModel.forward (eval mode)."""
    B, T, D = x.shape
    H = params["l0_fwd"][1].shape[0]
    Bp = BATCH_PAD
    assert B <= Bp
    bf16 = jnp.bfloat16

    # time-major, batch padded to 8 sublanes, flattened: row index = t*Bp + b
    xt = jnp.transpose(x, (1, 0, 2))                         # (T, B, D)
    xt = jnp.pad(xt, ((0, 0), (0, Bp - B), (0, 0)))          # (T, Bp, D)
    x_flat = xt.reshape(T * Bp, D).astype(bf16)

    wih0f, whh0f, b0f = params["l0_fwd"]
    wih0b, whh0b, b0b = params["l0_bwd"]
    wih1f, whh1f, b1f = params["l1_fwd"]
    wih1b, _whh1b, b1b = params["l1_bwd"]     # W_hh of l1-bwd is provably unused
    (w1, bias1), (w2, bias2), (w3, bias3) = params["fc"]

    # Fused layer-1 weights: input proj concatenated along lanes, W_hh as a
    # block-diagonal so one matmul serves both directions.
    w_in0 = jnp.concatenate([wih0f, wih0b], axis=1).astype(bf16)   # (D, 8H)
    b_in0 = jnp.concatenate([b0f, b0b], axis=1)                    # (1, 8H) f32
    w_hh0 = jnp.zeros((2 * H, 8 * H), jnp.float32)
    w_hh0 = w_hh0.at[0:H, 0:4 * H].set(whh0f)
    w_hh0 = w_hh0.at[H:2 * H, 4 * H:8 * H].set(whh0b)
    w_hh0 = w_hh0.astype(bf16)                                     # (2H, 8H)

    n_in = 15
    out = pl.pallas_call(
        functools.partial(_fused_kernel, seq_len=T, batch_pad=Bp, hidden=H),
        out_shape=jax.ShapeDtypeStruct((Bp, 1), jnp.float32),
        in_specs=[pl.BlockSpec(memory_space=pltpu.MemorySpace.VMEM)] * n_in,
        out_specs=pl.BlockSpec(memory_space=pltpu.MemorySpace.VMEM),
        scratch_shapes=[
            pltpu.VMEM((T * Bp, 8 * H), jnp.float32),  # fused layer-1 gate proj
            pltpu.VMEM((T * Bp, 2 * H), jnp.float32),  # packed layer-1 outputs
            pltpu.VMEM((T * Bp, 4 * H), jnp.float32),  # layer-2 fwd gate proj
        ],
    )(x_flat,
      w_in0, b_in0, w_hh0,
      wih1f.astype(bf16), whh1f.astype(bf16), b1f,
      wih1b.astype(bf16), b1b,
      w1.astype(bf16), bias1, w2.astype(bf16), bias2, w3.astype(bf16), bias3)
    return out[:B].astype(x.dtype)


# ----------------------------------------------------------------------------
# Pure-JAX f32 reference (for a correctness check)
# ----------------------------------------------------------------------------
def _reference_forward(x, params):
    def cell_seq(x_tbd, w_ih, w_hh, b, reverse):
        Tn, Bn, _ = x_tbd.shape
        Hn = w_hh.shape[0]
        h = jnp.zeros((Bn, Hn), jnp.float32)
        c = jnp.zeros((Bn, Hn), jnp.float32)
        outs = [None] * Tn
        order = range(Tn - 1, -1, -1) if reverse else range(Tn)
        for t in order:
            g = x_tbd[t] @ w_ih + h @ w_hh + b
            i = jax.nn.sigmoid(g[:, 0 * Hn:1 * Hn])
            f = jax.nn.sigmoid(g[:, 1 * Hn:2 * Hn])
            gg = jnp.tanh(g[:, 2 * Hn:3 * Hn])
            o = jax.nn.sigmoid(g[:, 3 * Hn:4 * Hn])
            c = f * c + i * gg
            h = o * jnp.tanh(c)
            outs[t] = h
        return jnp.stack(outs)

    h = jnp.transpose(x, (1, 0, 2))
    for layer in range(2):
        fwd = cell_seq(h, *params[f"l{layer}_fwd"], reverse=False)
        bwd = cell_seq(h, *params[f"l{layer}_bwd"], reverse=True)
        h = jnp.concatenate([fwd, bwd], axis=-1)
    last = h[-1]
    (w1, b1), (w2, b2), (w3, b3) = params["fc"]
    a1 = jnp.maximum(last @ w1 + b1, 0.0)
    a2 = jnp.maximum(a1 @ w2 + b2, 0.0)
    return a2 @ w3 + b3


# ----------------------------------------------------------------------------
# Deterministic parameter init (PyTorch-style uniform ranges)
# ----------------------------------------------------------------------------
def init_params(key, input_size, hidden_size):
    H = hidden_size
    params = {}
    keys = iter(jax.random.split(key, 32))

    def uni(shape, bound):
        return jax.random.uniform(next(keys), shape, jnp.float32, -bound, bound)

    # LSTM weights, stored transposed: (D_in, 4H) / (H, 4H); gate order [i,f,g,o]
    k_lstm = 1.0 / (H ** 0.5)
    layer_inputs = [input_size, 2 * H]
    for layer in range(2):
        d_in = layer_inputs[layer]
        for direction in ("fwd", "bwd"):
            w_ih = uni((d_in, 4 * H), k_lstm)
            w_hh = uni((H, 4 * H), k_lstm)
            b = uni((1, 4 * H), k_lstm) + uni((1, 4 * H), k_lstm)  # b_ih + b_hh
            params[f"l{layer}_{direction}"] = (w_ih, w_hh, b)

    # fc head, weights stored as (in, out)
    def linear(din, dout):
        k = 1.0 / (din ** 0.5)
        return uni((din, dout), k), uni((1, dout), k)

    params["fc"] = (linear(2 * H, 64), linear(64, 32), linear(32, 1))
    return params


# ----------------------------------------------------------------------------
if __name__ == "__main__":
    B, T, INPUT_SIZE, HIDDEN_SIZE = 2, 8, 16, 32

    key = jax.random.PRNGKey(0)
    k_x, k_p = jax.random.split(key)
    x = jax.random.normal(k_x, (B, T, INPUT_SIZE), dtype=jnp.float32)
    params = init_params(k_p, INPUT_SIZE, HIDDEN_SIZE)

    fwd = jax.jit(lstm_model_forward)
    out = fwd(x, params)
    jax.block_until_ready(out)
    assert out.shape == (B, 1), out.shape

    # bf16 matmul operands (f32 accumulation) drift slightly from the f32
    # reference -> loosened tolerance.
    ref = _reference_forward(x, params)
    assert jnp.allclose(out, ref, rtol=5e-2, atol=5e-2), (out, ref)

    print("KERNEL_OK")
</pallas_src>

<mosaic_0001>
module attributes {stable_mosaic.version = 11 : i64} {
  func.func @_fused_kernel(%arg0: memref<64x16xbf16, #tpu.memory_space<vmem>>, %arg1: memref<16x256xbf16, #tpu.memory_space<vmem>>, %arg2: memref<1x256xf32, #tpu.memory_space<vmem>>, %arg3: memref<64x256xbf16, #tpu.memory_space<vmem>>, %arg4: memref<64x128xbf16, #tpu.memory_space<vmem>>, %arg5: memref<32x128xbf16, #tpu.memory_space<vmem>>, %arg6: memref<1x128xf32, #tpu.memory_space<vmem>>, %arg7: memref<64x128xbf16, #tpu.memory_space<vmem>>, %arg8: memref<1x128xf32, #tpu.memory_space<vmem>>, %arg9: memref<64x64xbf16, #tpu.memory_space<vmem>>, %arg10: memref<1x64xf32, #tpu.memory_space<vmem>>, %arg11: memref<64x32xbf16, #tpu.memory_space<vmem>>, %arg12: memref<1x32xf32, #tpu.memory_space<vmem>>, %arg13: memref<32x1xbf16, #tpu.memory_space<vmem>>, %arg14: memref<1x1xf32, #tpu.memory_space<vmem>>, %arg15: memref<8x1xf32, #tpu.memory_space<vmem>>, %arg16: memref<64x256xf32, #tpu.memory_space<vmem>>, %arg17: memref<64x64xf32, #tpu.memory_space<vmem>>, %arg18: memref<64x128xf32, #tpu.memory_space<vmem>>) attributes {dimension_semantics = [], scalar_prefetch = 0 : i64, scratch_operands = 3 : i64, tpu.core_type = #tpu.core_type<tc>} {
    %c0 = arith.constant 0 : index
    %c0_0 = arith.constant 0 : index
    %0 = vector.load %arg0[%c0, %c0_0] : memref<64x16xbf16, #tpu.memory_space<vmem>>, vector<64x16xbf16>
    %c0_1 = arith.constant 0 : index
    %c0_2 = arith.constant 0 : index
    %1 = vector.load %arg1[%c0_1, %c0_2] : memref<16x256xbf16, #tpu.memory_space<vmem>>, vector<16x256xbf16>
    %cst = arith.constant dense<0.000000e+00> : vector<64x256xf32>
    %2 = tpu.matmul %0, %1, %cst {dimension_numbers = #tpu.dot_dimension_numbers<[1], [0], [0], [1], [0, 0, 1, 1], [], []>} : vector<64x16xbf16>, vector<16x256xbf16>, vector<64x256xf32> -> vector<64x256xf32>
    %c0_3 = arith.constant 0 : index
    %c0_4 = arith.constant 0 : index
    %3 = vector.load %arg2[%c0_3, %c0_4] : memref<1x256xf32, #tpu.memory_space<vmem>>, vector<1x256xf32>
    %4 = vector.broadcast %3 : vector<1x256xf32> to vector<64x256xf32>
    %5 = arith.addf %2, %4 : vector<64x256xf32>
    %c0_5 = arith.constant 0 : index
    %c0_6 = arith.constant 0 : index
    %6 = vector.load %arg16[%c0_5, %c0_6] : memref<64x256xf32, #tpu.memory_space<vmem>>, vector<64x256xf32>
    tpu.vector_store %arg16[%c0_5, %c0_6], %5 {strides = array<i32>} : memref<64x256xf32, #tpu.memory_space<vmem>>, vector<64x256xf32>,
    %c0_7 = arith.constant 0 : index
    %c0_8 = arith.constant 0 : index
    %7 = vector.load %arg3[%c0_7, %c0_8] : memref<64x256xbf16, #tpu.memory_space<vmem>>, vector<64x256xbf16>
    %cst_9 = arith.constant 0.000000e+00 : f32
    %8 = vector.broadcast %cst_9 : f32 to vector<8x32xf32>
    %cst_10 = arith.constant 0.000000e+00 : f32
    %9 = vector.broadcast %cst_10 : f32 to vector<8x32xf32>
    %cst_11 = arith.constant 0.000000e+00 : f32
    %10 = vector.broadcast %cst_11 : f32 to vector<8x32xf32>
    %cst_12 = arith.constant 0.000000e+00 : f32
    %11 = vector.broadcast %cst_12 : f32 to vector<8x32xf32>
    %12 = tpu.concatenate %8, %10 in 1 : vector<8x32xf32>, vector<8x32xf32> -> vector<8x64xf32>
    %c0_13 = arith.constant 0 : index
    %c0_14 = arith.constant 0 : index
    %13 = vector.load %arg16[%c0_13, %c0_14] : memref<64x256xf32, #tpu.memory_space<vmem>>, vector<8x128xf32>
    %c56 = arith.constant 56 : index
    %c128 = arith.constant 128 : index
    %14 = vector.load %arg16[%c56, %c128] : memref<64x256xf32, #tpu.memory_space<vmem>>, vector<8x128xf32>
    %15 = tpu.concatenate %13, %14 in 1 : vector<8x128xf32>, vector<8x128xf32> -> vector<8x256xf32>
    %16 = arith.truncf %12 : vector<8x64xf32> to vector<8x64xbf16>
    %cst_15 = arith.constant dense<0.000000e+00> : vector<8x256xf32>
    %17 = tpu.matmul %16, %7, %cst_15 {dimension_numbers = #tpu.dot_dimension_numbers<[1], [0], [0], [1], [0, 0, 1, 1], [], []>} : vector<8x64xbf16>, vector<64x256xbf16>, vector<8x256xf32> -> vector<8x256xf32>
    %18 = arith.addf %15, %17 : vector<8x256xf32>
    %cst_16 = arith.constant 5.000000e-01 : f32
    %19 = vector.broadcast %cst_16 : f32 to vector<8x256xf32>
    %20 = arith.mulf %19, %18 : vector<8x256xf32>
    %21 = math.tanh %20 : vector<8x256xf32>
    %cst_17 = arith.constant 5.000000e-01 : f32
    %22 = vector.broadcast %cst_17 : f32 to vector<8x256xf32>
    %23 = arith.mulf %22, %21 : vector<8x256xf32>
    %cst_18 = arith.constant 5.000000e-01 : f32
    %24 = vector.broadcast %cst_18 : f32 to vector<8x256xf32>
    %25 = arith.addf %23, %24 : vector<8x256xf32>
    %26 = math.tanh %18 : vector<8x256xf32>
    %27 = vector.extract_strided_slice %25 {offsets = [0, 32], sizes = [8, 32], strides = [1, 1]} : vector<8x256xf32> to vector<8x32xf32>
    %28 = arith.mulf %27, %9 : vector<8x32xf32>
    %29 = vector.extract_strided_slice %25 {offsets = [0, 0], sizes = [8, 32], strides = [1, 1]} : vector<8x256xf32> to vector<8x32xf32>
    %30 = vector.extract_strided_slice %26 {offsets = [0, 64], sizes = [8, 32], strides = [1, 1]} : vector<8x256xf32> to vector<8x32xf32>
    %31 = arith.mulf %29, %30 : vector<8x32xf32>
    %32 = arith.addf %28, %31 : vector<8x32xf32>
    %33 = vector.extract_strided_slice %25 {offsets = [0, 96], sizes = [8, 32], strides = [1, 1]} : vector<8x256xf32> to vector<8x32xf32>
    %34 = math.tanh %32 : vector<8x32xf32>
    %35 = arith.mulf %33, %34 : vector<8x32xf32>
    %36 = vector.extract_strided_slice %25 {offsets = [0, 160], sizes = [8, 32], strides = [1, 1]} : vector<8x256xf32> to vector<8x32xf32>
    %37 = arith.mulf %36, %11 : vector<8x32xf32>
    %38 = vector.extract_strided_slice %25 {offsets = [0, 128], sizes = [8, 32], strides = [1, 1]} : vector<8x256xf32> to vector<8x32xf32>
    %39 = vector.extract_strided_slice %26 {offsets = [0, 192], sizes = [8, 32], strides = [1, 1]} : vector<8x256xf32> to vector<8x32xf32>
    %40 = arith.mulf %38, %39 : vector<8x32xf32>
    %41 = arith.addf %37, %40 : vector<8x32xf32>
    %42 = vector.extract_strided_slice %25 {offsets = [0, 224], sizes = [8, 32], strides = [1, 1]} : vector<8x256xf32> to vector<8x32xf32>
    %43 = math.tanh %41 : vector<8x32xf32>
    %44 = arith.mulf %42, %43 : vector<8x32xf32>
    %c0_19 = arith.constant 0 : index
    %c0_20 = arith.constant 0 : index
    %45 = vector.load %arg17[%c0_19, %c0_20] : memref<64x64xf32, #tpu.memory_space<vmem>>, vector<8x32xf32>
    tpu.vector_store %arg17[%c0_19, %c0_20], %35 {strides = array<i32>} : memref<64x64xf32, #tpu.memory_space<vmem>>, vector<8x32xf32>,
    %c56_21 = arith.constant 56 : index
    %c32 = arith.constant 32 : index
    %46 = vector.load %arg17[%c56_21, %c32] : memref<64x64xf32, #tpu.memory_space<vmem>>, vector<8x32xf32>
    tpu.vector_store %arg17[%c56_21, %c32], %44 {strides = array<i32>} : memref<64x64xf32, #tpu.memory_space<vmem>>, vector<8x32xf32>,
    %47 = tpu.concatenate %35, %44 in 1 : vector<8x32xf32>, vector<8x32xf32> -> vector<8x64xf32>
    %c8 = arith.constant 8 : index
    %c0_22 = arith.constant 0 : index
    %48 = vector.load %arg16[%c8, %c0_22] : memref<64x256xf32, #tpu.memory_space<vmem>>, vector<8x128xf32>
    %c48 = arith.constant 48 : index
    %c128_23 = arith.constant 128 : index
    %49 = vector.load %arg16[%c48, %c128_23] : memref<64x256xf32, #tpu.memory_space<vmem>>, vector<8x128xf32>
    %50 = tpu.concatenate %48, %49 in 1 : vector<8x128xf32>, vector<8x128xf32> -> vector<8x256xf32>
    %51 = arith.truncf %47 : vector<8x64xf32> to vector<8x64xbf16>
    %cst_24 = arith.constant dense<0.000000e+00> : vector<8x256xf32>
    %52 = tpu.matmul %51, %7, %cst_24 {dimension_numbers = #tpu.dot_dimension_numbers<[1], [0], [0], [1], [0, 0, 1, 1], [], []>} : vector<8x64xbf16>, vector<64x256xbf16>, vector<8x256xf32> -> vector<8x256xf32>
    %53 = arith.addf %50, %52 : vector<8x256xf32>
    %cst_25 = arith.constant 5.000000e-01 : f32
    %54 = vector.broadcast %cst_25 : f32 to vector<8x256xf32>
    %55 = arith.mulf %54, %53 : vector<8x256xf32>
    %56 = math.tanh %55 : vector<8x256xf32>
    %cst_26 = arith.constant 5.000000e-01 : f32
    %57 = vector.broadcast %cst_26 : f32 to vector<8x256xf32>
    %58 = arith.mulf %57, %56 : vector<8x256xf32>
    %cst_27 = arith.constant 5.000000e-01 : f32
    %59 = vector.broadcast %cst_27 : f32 to vector<8x256xf32>
    %60 = arith.addf %58, %59 : vector<8x256xf32>
    %61 = math.tanh %53 : vector<8x256xf32>
    %62 = vector.extract_strided_slice %60 {offsets = [0, 32], sizes = [8, 32], strides = [1, 1]} : vector<8x256xf32> to vector<8x32xf32>
    %63 = arith.mulf %62, %32 : vector<8x32xf32>
    %64 = vector.extract_strided_slice %60 {offsets = [0, 0], sizes = [8, 32], strides = [1, 1]} : vector<8x256xf32> to vector<8x32xf32>
    %65 = vector.extract_strided_slice %61 {offsets = [0, 64], sizes = [8, 32], strides = [1, 1]} : vector<8x256xf32> to vector<8x32xf32>
    %66 = arith.mulf %64, %65 : vector<8x32xf32>
    %67 = arith.addf %63, %66 : vector<8x32xf32>
    %68 = vector.extract_strided_slice %60 {offsets = [0, 96], sizes = [8, 32], strides = [1, 1]} : vector<8x256xf32> to vector<8x32xf32>
    %69 = math.tanh %67 : vector<8x32xf32>
    %70 = arith.mulf %68, %69 : vector<8x32xf32>
    %71 = vector.extract_strided_slice %60 {offsets = [0, 160], sizes = [8, 32], strides = [1, 1]} : vector<8x256xf32> to vector<8x32xf32>
    %72 = arith.mulf %71, %41 : vector<8x32xf32>
    %73 = vector.extract_strided_slice %60 {offsets = [0, 128], sizes = [8, 32], strides = [1, 1]} : vector<8x256xf32> to vector<8x32xf32>
    %74 = vector.extract_strided_slice %61 {offsets = [0, 192], sizes = [8, 32], strides = [1, 1]} : vector<8x256xf32> to vector<8x32xf32>
    %75 = arith.mulf %73, %74 : vector<8x32xf32>
    %76 = arith.addf %72, %75 : vector<8x32xf32>
    %77 = vector.extract_strided_slice %60 {offsets = [0, 224], sizes = [8, 32], strides = [1, 1]} : vector<8x256xf32> to vector<8x32xf32>
    %78 = math.tanh %76 : vector<8x32xf32>
    %79 = arith.mulf %77, %78 : vector<8x32xf32>
    %c8_28 = arith.constant 8 : index
    %c0_29 = arith.constant 0 : index
    %80 = vector.load %arg17[%c8_28, %c0_29] : memref<64x64xf32, #tpu.memory_space<vmem>>, vector<8x32xf32>
    tpu.vector_store %arg17[%c8_28, %c0_29], %70 {strides = array<i32>} : memref<64x64xf32, #tpu.memory_space<vmem>>, vector<8x32xf32>,
    %c48_30 = arith.constant 48 : index
    %c32_31 = arith.constant 32 : index
    %81 = vector.load %arg17[%c48_30, %c32_31] : memref<64x64xf32, #tpu.memory_space<vmem>>, vector<8x32xf32>
    tpu.vector_store %arg17[%c48_30, %c32_31], %79 {strides = array<i32>} : memref<64x64xf32, #tpu.memory_space<vmem>>, vector<8x32xf32>,
    %82 = tpu.concatenate %70, %79 in 1 : vector<8x32xf32>, vector<8x32xf32> -> vector<8x64xf32>
    %c16 = arith.constant 16 : index
    %c0_32 = arith.constant 0 : index
    %83 = vector.load %arg16[%c16, %c0_32] : memref<64x256xf32, #tpu.memory_space<vmem>>, vector<8x128xf32>
    %c40 = arith.constant 40 : index
    %c128_33 = arith.constant 128 : index
    %84 = vector.load %arg16[%c40, %c128_33] : memref<64x256xf32, #tpu.memory_space<vmem>>, vector<8x128xf32>
    %85 = tpu.concatenate %83, %84 in 1 : vector<8x128xf32>, vector<8x128xf32> -> vector<8x256xf32>
    %86 = arith.truncf %82 : vector<8x64xf32> to vector<8x64xbf16>
    %cst_34 = arith.constant dense<0.000000e+00> : vector<8x256xf32>
    %87 = tpu.matmul %86, %7, %cst_34 {dimension_numbers = #tpu.dot_dimension_numbers<[1], [0], [0], [1], [0, 0, 1, 1], [], []>} : vector<8x64xbf16>, vector<64x256xbf16>, vector<8x256xf32> -> vector<8x256xf32>
    %88 = arith.addf %85, %87 : vector<8x256xf32>
    %cst_35 = arith.constant 5.000000e-01 : f32
    %89 = vector.broadcast %cst_35 : f32 to vector<8x256xf32>
    %90 = arith.mulf %89, %88 : vector<8x256xf32>
    %91 = math.tanh %90 : vector<8x256xf32>
    %cst_36 = arith.constant 5.000000e-01 : f32
    %92 = vector.broadcast %cst_36 : f32 to vector<8x256xf32>
    %93 = arith.mulf %92, %91 : vector<8x256xf32>
    %cst_37 = arith.constant 5.000000e-01 : f32
    %94 = vector.broadcast %cst_37 : f32 to vector<8x256xf32>
    %95 = arith.addf %93, %94 : vector<8x256xf32>
    %96 = math.tanh %88 : vector<8x256xf32>
    %97 = vector.extract_strided_slice %95 {offsets = [0, 32], sizes = [8, 32], strides = [1, 1]} : vector<8x256xf32> to vector<8x32xf32>
    %98 = arith.mulf %97, %67 : vector<8x32xf32>
    %99 = vector.extract_strided_slice %95 {offsets = [0, 0], sizes = [8, 32], strides = [1, 1]} : vector<8x256xf32> to vector<8x32xf32>
    %100 = vector.extract_strided_slice %96 {offsets = [0, 64], sizes = [8, 32], strides = [1, 1]} : vector<8x256xf32> to vector<8x32xf32>
    %101 = arith.mulf %99, %100 : vector<8x32xf32>
    %102 = arith.addf %98, %101 : vector<8x32xf32>
    %103 = vector.extract_strided_slice %95 {offsets = [0, 96], sizes = [8, 32], strides = [1, 1]} : vector<8x256xf32> to vector<8x32xf32>
    %104 = math.tanh %102 : vector<8x32xf32>
    %105 = arith.mulf %103, %104 : vector<8x32xf32>
    %106 = vector.extract_strided_slice %95 {offsets = [0, 160], sizes = [8, 32], strides = [1, 1]} : vector<8x256xf32> to vector<8x32xf32>
    %107 = arith.mulf %106, %76 : vector<8x32xf32>
    %108 = vector.extract_strided_slice %95 {offsets = [0, 128], sizes = [8, 32], strides = [1, 1]} : vector<8x256xf32> to vector<8x32xf32>
    %109 = vector.extract_strided_slice %96 {offsets = [0, 192], sizes = [8, 32], strides = [1, 1]} : vector<8x256xf32> to vector<8x32xf32>
    %110 = arith.mulf %108, %109 : vector<8x32xf32>
    %111 = arith.addf %107, %110 : vector<8x32xf32>
    %112 = vector.extract_strided_slice %95 {offsets = [0, 224], sizes = [8, 32], strides = [1, 1]} : vector<8x256xf32> to vector<8x32xf32>
    %113 = math.tanh %111 : vector<8x32xf32>
    %114 = arith.mulf %112, %113 : vector<8x32xf32>
    %c16_38 = arith.constant 16 : index
    %c0_39 = arith.constant 0 : index
    %115 = vector.load %arg17[%c16_38, %c0_39] : memref<64x64xf32, #tpu.memory_space<vmem>>, vector<8x32xf32>
    tpu.vector_store %arg17[%c16_38, %c0_39], %105 {strides = array<i32>} : memref<64x64xf32, #tpu.memory_space<vmem>>, vector<8x32xf32>,
    %c40_40 = arith.constant 40 : index
    %c32_41 = arith.constant 32 : index
    %116 = vector.load %arg17[%c40_40, %c32_41] : memref<64x64xf32, #tpu.memory_space<vmem>>, vector<8x32xf32>
    tpu.vector_store %arg17[%c40_40, %c32_41], %114 {strides = array<i32>} : memref<64x64xf32, #tpu.memory_space<vmem>>, vector<8x32xf32>,
    %117 = tpu.concatenate %105, %114 in 1 : vector<8x32xf32>, vector<8x32xf32> -> vector<8x64xf32>
    %c24 = arith.constant 24 : index
    %c0_42 = arith.constant 0 : index
    %118 = vector.load %arg16[%c24, %c0_42] : memref<64x256xf32, #tpu.memory_space<vmem>>, vector<8x128xf32>
    %c32_43 = arith.constant 32 : index
    %c128_44 = arith.constant 128 : index
    %119 = vector.load %arg16[%c32_43, %c128_44] : memref<64x256xf32, #tpu.memory_space<vmem>>, vector<8x128xf32>
    %120 = tpu.concatenate %118, %119 in 1 : vector<8x128xf32>, vector<8x128xf32> -> vector<8x256xf32>
    %121 = arith.truncf %117 : vector<8x64xf32> to vector<8x64xbf16>
    %cst_45 = arith.constant dense<0.000000e+00> : vector<8x256xf32>
    %122 = tpu.matmul %121, %7, %cst_45 {dimension_numbers = #tpu.dot_dimension_numbers<[1], [0], [0], [1], [0, 0, 1, 1], [], []>} : vector<8x64xbf16>, vector<64x256xbf16>, vector<8x256xf32> -> vector<8x256xf32>
    %123 = arith.addf %120, %122 : vector<8x256xf32>
    %cst_46 = arith.constant 5.000000e-01 : f32
    %124 = vector.broadcast %cst_46 : f32 to vector<8x256xf32>
    %125 = arith.mulf %124, %123 : vector<8x256xf32>
    %126 = math.tanh %125 : vector<8x256xf32>
    %cst_47 = arith.constant 5.000000e-01 : f32
    %127 = vector.broadcast %cst_47 : f32 to vector<8x256xf32>
    %128 = arith.mulf %127, %126 : vector<8x256xf32>
    %cst_48 = arith.constant 5.000000e-01 : f32
    %129 = vector.broadcast %cst_48 : f32 to vector<8x256xf32>
    %130 = arith.addf %128, %129 : vector<8x256xf32>
    %131 = math.tanh %123 : vector<8x256xf32>
    %132 = vector.extract_strided_slice %130 {offsets = [0, 32], sizes = [8, 32], strides = [1, 1]} : vector<8x256xf32> to vector<8x32xf32>
    %133 = arith.mulf %132, %102 : vector<8x32xf32>
    %134 = vector.extract_strided_slice %130 {offsets = [0, 0], sizes = [8, 32], strides = [1, 1]} : vector<8x256xf32> to vector<8x32xf32>
    %135 = vector.extract_strided_slice %131 {offsets = [0, 64], sizes = [8, 32], strides = [1, 1]} : vector<8x256xf32> to vector<8x32xf32>
    %136 = arith.mulf %134, %135 : vector<8x32xf32>
    %137 = arith.addf %133, %136 : vector<8x32xf32>
    %138 = vector.extract_strided_slice %130 {offsets = [0, 96], sizes = [8, 32], strides = [1, 1]} : vector<8x256xf32> to vector<8x32xf32>
    %139 = math.tanh %137 : vector<8x32xf32>
    %140 = arith.mulf %138, %139 : vector<8x32xf32>
    %141 = vector.extract_strided_slice %130 {offsets = [0, 160], sizes = [8, 32], strides = [1, 1]} : vector<8x256xf32> to vector<8x32xf32>
    %142 = arith.mulf %141, %111 : vector<8x32xf32>
    %143 = vector.extract_strided_slice %130 {offsets = [0, 128], sizes = [8, 32], strides = [1, 1]} : vector<8x256xf32> to vector<8x32xf32>
    %144 = vector.extract_strided_slice %131 {offsets = [0, 192], sizes = [8, 32], strides = [1, 1]} : vector<8x256xf32> to vector<8x32xf32>
    %145 = arith.mulf %143, %144 : vector<8x32xf32>
    %146 = arith.addf %142, %145 : vector<8x32xf32>
    %147 = vector.extract_strided_slice %130 {offsets = [0, 224], sizes = [8, 32], strides = [1, 1]} : vector<8x256xf32> to vector<8x32xf32>
    %148 = math.tanh %146 : vector<8x32xf32>
    %149 = arith.mulf %147, %148 : vector<8x32xf32>
    %c24_49 = arith.constant 24 : index
    %c0_50 = arith.constant 0 : index
    %150 = vector.load %arg17[%c24_49, %c0_50] : memref<64x64xf32, #tpu.memory_space<vmem>>, vector<8x32xf32>
    tpu.vector_store %arg17[%c24_49, %c0_50], %140 {strides = array<i32>} : memref<64x64xf32, #tpu.memory_space<vmem>>, vector<8x32xf32>,
    %c32_51 = arith.constant 32 : index
    %c32_52 = arith.constant 32 : index
    %151 = vector.load %arg17[%c32_51, %c32_52] : memref<64x64xf32, #tpu.memory_space<vmem>>, vector<8x32xf32>
    tpu.vector_store %arg17[%c32_51, %c32_52], %149 {strides = array<i32>} : memref<64x64xf32, #tpu.memory_space<vmem>>, vector<8x32xf32>,
    %152 = tpu.concatenate %140, %149 in 1 : vector<8x32xf32>, vector<8x32xf32> -> vector<8x64xf32>
    %c32_53 = arith.constant 32 : index
    %c0_54 = arith.constant 0 : index
    %153 = vector.load %arg16[%c32_53, %c0_54] : memref<64x256xf32, #tpu.memory_space<vmem>>, vector<8x128xf32>
    %c24_55 = arith.constant 24 : index
    %c128_56 = arith.constant 128 : index
    %154 = vector.load %arg16[%c24_55, %c128_56] : memref<64x256xf32, #tpu.memory_space<vmem>>, vector<8x128xf32>
    %155 = tpu.concatenate %153, %154 in 1 : vector<8x128xf32>, vector<8x128xf32> -> vector<8x256xf32>
    %156 = arith.truncf %152 : vector<8x64xf32> to vector<8x64xbf16>
    %cst_57 = arith.constant dense<0.000000e+00> : vector<8x256xf32>
    %157 = tpu.matmul %156, %7, %cst_57 {dimension_numbers = #tpu.dot_dimension_numbers<[1], [0], [0], [1], [0, 0, 1, 1], [], []>} : vector<8x64xbf16>, vector<64x256xbf16>, vector<8x256xf32> -> vector<8x256xf32>
    %158 = arith.addf %155, %157 : vector<8x256xf32>
    %cst_58 = arith.constant 5.000000e-01 : f32
    %159 = vector.broadcast %cst_58 : f32 to vector<8x256xf32>
    %160 = arith.mulf %159, %158 : vector<8x256xf32>
    %161 = math.tanh %160 : vector<8x256xf32>
    %cst_59 = arith.constant 5.000000e-01 : f32
    %162 = vector.broadcast %cst_59 : f32 to vector<8x256xf32>
    %163 = arith.mulf %162, %161 : vector<8x256xf32>
    %cst_60 = arith.constant 5.000000e-01 : f32
    %164 = vector.broadcast %cst_60 : f32 to vector<8x256xf32>
    %165 = arith.addf %163, %164 : vector<8x256xf32>
    %166 = math.tanh %158 : vector<8x256xf32>
    %167 = vector.extract_strided_slice %165 {offsets = [0, 32], sizes = [8, 32], strides = [1, 1]} : vector<8x256xf32> to vector<8x32xf32>
    %168 = arith.mulf %167, %137 : vector<8x32xf32>
    %169 = vector.extract_strided_slice %165 {offsets = [0, 0], sizes = [8, 32], strides = [1, 1]} : vector<8x256xf32> to vector<8x32xf32>
    %170 = vector.extract_strided_slice %166 {offsets = [0, 64], sizes = [8, 32], strides = [1, 1]} : vector<8x256xf32> to vector<8x32xf32>
    %171 = arith.mulf %169, %170 : vector<8x32xf32>
    %172 = arith.addf %168, %171 : vector<8x32xf32>
    %173 = vector.extract_strided_slice %165 {offsets = [0, 96], sizes = [8, 32], strides = [1, 1]} : vector<8x256xf32> to vector<8x32xf32>
    %174 = math.tanh %172 : vector<8x32xf32>
    %175 = arith.mulf %173, %174 : vector<8x32xf32>
    %176 = vector.extract_strided_slice %165 {offsets = [0, 160], sizes = [8, 32], strides = [1, 1]} : vector<8x256xf32> to vector<8x32xf32>
    %177 = arith.mulf %176, %146 : vector<8x32xf32>
    %178 = vector.extract_strided_slice %165 {offsets = [0, 128], sizes = [8, 32], strides = [1, 1]} : vector<8x256xf32> to vector<8x32xf32>
    %179 = vector.extract_strided_slice %166 {offsets = [0, 192], sizes = [8, 32], strides = [1, 1]} : vector<8x256xf32> to vector<8x32xf32>
    %180 = arith.mulf %178, %179 : vector<8x32xf32>
    %181 = arith.addf %177, %180 : vector<8x32xf32>
    %182 = vector.extract_strided_slice %165 {offsets = [0, 224], sizes = [8, 32], strides = [1, 1]} : vector<8x256xf32> to vector<8x32xf32>
    %183 = math.tanh %181 : vector<8x32xf32>
    %184 = arith.mulf %182, %183 : vector<8x32xf32>
    %c32_61 = arith.constant 32 : index
    %c0_62 = arith.constant 0 : index
    %185 = vector.load %arg17[%c32_61, %c0_62] : memref<64x64xf32, #tpu.memory_space<vmem>>, vector<8x32xf32>
    tpu.vector_store %arg17[%c32_61, %c0_62], %175 {strides = array<i32>} : memref<64x64xf32, #tpu.memory_space<vmem>>, vector<8x32xf32>,
    %c24_63 = arith.constant 24 : index
    %c32_64 = arith.constant 32 : index
    %186 = vector.load %arg17[%c24_63, %c32_64] : memref<64x64xf32, #tpu.memory_space<vmem>>, vector<8x32xf32>
    tpu.vector_store %arg17[%c24_63, %c32_64], %184 {strides = array<i32>} : memref<64x64xf32, #tpu.memory_space<vmem>>, vector<8x32xf32>,
    %187 = tpu.concatenate %175, %184 in 1 : vector<8x32xf32>, vector<8x32xf32> -> vector<8x64xf32>
    %c40_65 = arith.constant 40 : index
    %c0_66 = arith.constant 0 : index
    %188 = vector.load %arg16[%c40_65, %c0_66] : memref<64x256xf32, #tpu.memory_space<vmem>>, vector<8x128xf32>
    %c16_67 = arith.constant 16 : index
    %c128_68 = arith.constant 128 : index
    %189 = vector.load %arg16[%c16_67, %c128_68] : memref<64x256xf32, #tpu.memory_space<vmem>>, vector<8x128xf32>
    %190 = tpu.concatenate %188, %189 in 1 : vector<8x128xf32>, vector<8x128xf32> -> vector<8x256xf32>
    %191 = arith.truncf %187 : vector<8x64xf32> to vector<8x64xbf16>
    %cst_69 = arith.constant dense<0.000000e+00> : vector<8x256xf32>
    %192 = tpu.matmul %191, %7, %cst_69 {dimension_numbers = #tpu.dot_dimension_numbers<[1], [0], [0], [1], [0, 0, 1, 1], [], []>} : vector<8x64xbf16>, vector<64x256xbf16>, vector<8x256xf32> -> vector<8x256xf32>
    %193 = arith.addf %190, %192 : vector<8x256xf32>
    %cst_70 = arith.constant 5.000000e-01 : f32
    %194 = vector.broadcast %cst_70 : f32 to vector<8x256xf32>
    %195 = arith.mulf %194, %193 : vector<8x256xf32>
    %196 = math.tanh %195 : vector<8x256xf32>
    %cst_71 = arith.constant 5.000000e-01 : f32
    %197 = vector.broadcast %cst_71 : f32 to vector<8x256xf32>
    %198 = arith.mulf %197, %196 : vector<8x256xf32>
    %cst_72 = arith.constant 5.000000e-01 : f32
    %199 = vector.broadcast %cst_72 : f32 to vector<8x256xf32>
    %200 = arith.addf %198, %199 : vector<8x256xf32>
    %201 = math.tanh %193 : vector<8x256xf32>
    %202 = vector.extract_strided_slice %200 {offsets = [0, 32], sizes = [8, 32], strides = [1, 1]} : vector<8x256xf32> to vector<8x32xf32>
    %203 = arith.mulf %202, %172 : vector<8x32xf32>
    %204 = vector.extract_strided_slice %200 {offsets = [0, 0], sizes = [8, 32], strides = [1, 1]} : vector<8x256xf32> to vector<8x32xf32>
    %205 = vector.extract_strided_slice %201 {offsets = [0, 64], sizes = [8, 32], strides = [1, 1]} : vector<8x256xf32> to vector<8x32xf32>
    %206 = arith.mulf %204, %205 : vector<8x32xf32>
    %207 = arith.addf %203, %206 : vector<8x32xf32>
    %208 = vector.extract_strided_slice %200 {offsets = [0, 96], sizes = [8, 32], strides = [1, 1]} : vector<8x256xf32> to vector<8x32xf32>
    %209 = math.tanh %207 : vector<8x32xf32>
    %210 = arith.mulf %208, %209 : vector<8x32xf32>
    %211 = vector.extract_strided_slice %200 {offsets = [0, 160], sizes = [8, 32], strides = [1, 1]} : vector<8x256xf32> to vector<8x32xf32>
    %212 = arith.mulf %211, %181 : vector<8x32xf32>
    %213 = vector.extract_strided_slice %200 {offsets = [0, 128], sizes = [8, 32], strides = [1, 1]} : vector<8x256xf32> to vector<8x32xf32>
    %214 = vector.extract_strided_slice %201 {offsets = [0, 192], sizes = [8, 32], strides = [1, 1]} : vector<8x256xf32> to vector<8x32xf32>
    %215 = arith.mulf %213, %214 : vector<8x32xf32>
    %216 = arith.addf %212, %215 : vector<8x32xf32>
    %217 = vector.extract_strided_slice %200 {offsets = [0, 224], sizes = [8, 32], strides = [1, 1]} : vector<8x256xf32> to vector<8x32xf32>
    %218 = math.tanh %216 : vector<8x32xf32>
    %219 = arith.mulf %217, %218 : vector<8x32xf32>
    %c40_73 = arith.constant 40 : index
    %c0_74 = arith.constant 0 : index
    %220 = vector.load %arg17[%c40_73, %c0_74] : memref<64x64xf32, #tpu.memory_space<vmem>>, vector<8x32xf32>
    tpu.vector_store %arg17[%c40_73, %c0_74], %210 {strides = array<i32>} : memref<64x64xf32, #tpu.memory_space<vmem>>, vector<8x32xf32>,
    %c16_75 = arith.constant 16 : index
    %c32_76 = arith.constant 32 : index
    %221 = vector.load %arg17[%c16_75, %c32_76] : memref<64x64xf32, #tpu.memory_space<vmem>>, vector<8x32xf32>
    tpu.vector_store %arg17[%c16_75, %c32_76], %219 {strides = array<i32>} : memref<64x64xf32, #tpu.memory_space<vmem>>, vector<8x32xf32>,
    %222 = tpu.concatenate %210, %219 in 1 : vector<8x32xf32>, vector<8x32xf32> -> vector<8x64xf32>
    %c48_77 = arith.constant 48 : index
    %c0_78 = arith.constant 0 : index
    %223 = vector.load %arg16[%c48_77, %c0_78] : memref<64x256xf32, #tpu.memory_space<vmem>>, vector<8x128xf32>
    %c8_79 = arith.constant 8 : index
    %c128_80 = arith.constant 128 : index
    %224 = vector.load %arg16[%c8_79, %c128_80] : memref<64x256xf32, #tpu.memory_space<vmem>>, vector<8x128xf32>
    %225 = tpu.concatenate %223, %224 in 1 : vector<8x128xf32>, vector<8x128xf32> -> vector<8x256xf32>
    %226 = arith.truncf %222 : vector<8x64xf32> to vector<8x64xbf16>
    %cst_81 = arith.constant dense<0.000000e+00> : vector<8x256xf32>
    %227 = tpu.matmul %226, %7, %cst_81 {dimension_numbers = #tpu.dot_dimension_numbers<[1], [0], [0], [1], [0, 0, 1, 1], [], []>} : vector<8x64xbf16>, vector<64x256xbf16>, vector<8x256xf32> -> vector<8x256xf32>
    %228 = arith.addf %225, %227 : vector<8x256xf32>
    %cst_82 = arith.constant 5.000000e-01 : f32
    %229 = vector.broadcast %cst_82 : f32 to vector<8x256xf32>
    %230 = arith.mulf %229, %228 : vector<8x256xf32>
    %231 = math.tanh %230 : vector<8x256xf32>
    %cst_83 = arith.constant 5.000000e-01 : f32
    %232 = vector.broadcast %cst_83 : f32 to vector<8x256xf32>
    %233 = arith.mulf %232, %231 : vector<8x256xf32>
    %cst_84 = arith.constant 5.000000e-01 : f32
    %234 = vector.broadcast %cst_84 : f32 to vector<8x256xf32>
    %235 = arith.addf %233, %234 : vector<8x256xf32>
    %236 = math.tanh %228 : vector<8x256xf32>
    %237 = vector.extract_strided_slice %235 {offsets = [0, 32], sizes = [8, 32], strides = [1, 1]} : vector<8x256xf32> to vector<8x32xf32>
    %238 = arith.mulf %237, %207 : vector<8x32xf32>
    %239 = vector.extract_strided_slice %235 {offsets = [0, 0], sizes = [8, 32], strides = [1, 1]} : vector<8x256xf32> to vector<8x32xf32>
    %240 = vector.extract_strided_slice %236 {offsets = [0, 64], sizes = [8, 32], strides = [1, 1]} : vector<8x256xf32> to vector<8x32xf32>
    %241 = arith.mulf %239, %240 : vector<8x32xf32>
    %242 = arith.addf %238, %241 : vector<8x32xf32>
    %243 = vector.extract_strided_slice %235 {offsets = [0, 96], sizes = [8, 32], strides = [1, 1]} : vector<8x256xf32> to vector<8x32xf32>
    %244 = math.tanh %242 : vector<8x32xf32>
    %245 = arith.mulf %243, %244 : vector<8x32xf32>
    %246 = vector.extract_strided_slice %235 {offsets = [0, 160], sizes = [8, 32], strides = [1, 1]} : vector<8x256xf32> to vector<8x32xf32>
    %247 = arith.mulf %246, %216 : vector<8x32xf32>
    %248 = vector.extract_strided_slice %235 {offsets = [0, 128], sizes = [8, 32], strides = [1, 1]} : vector<8x256xf32> to vector<8x32xf32>
    %249 = vector.extract_strided_slice %236 {offsets = [0, 192], sizes = [8, 32], strides = [1, 1]} : vector<8x256xf32> to vector<8x32xf32>
    %250 = arith.mulf %248, %249 : vector<8x32xf32>
    %251 = arith.addf %247, %250 : vector<8x32xf32>
    %252 = vector.extract_strided_slice %235 {offsets = [0, 224], sizes = [8, 32], strides = [1, 1]} : vector<8x256xf32> to vector<8x32xf32>
    %253 = math.tanh %251 : vector<8x32xf32>
    %254 = arith.mulf %252, %253 : vector<8x32xf32>
    %c48_85 = arith.constant 48 : index
    %c0_86 = arith.constant 0 : index
    %255 = vector.load %arg17[%c48_85, %c0_86] : memref<64x64xf32, #tpu.memory_space<vmem>>, vector<8x32xf32>
    tpu.vector_store %arg17[%c48_85, %c0_86], %245 {strides = array<i32>} : memref<64x64xf32, #tpu.memory_space<vmem>>, vector<8x32xf32>,
    %c8_87 = arith.constant 8 : index
    %c32_88 = arith.constant 32 : index
    %256 = vector.load %arg17[%c8_87, %c32_88] : memref<64x64xf32, #tpu.memory_space<vmem>>, vector<8x32xf32>
    tpu.vector_store %arg17[%c8_87, %c32_88], %254 {strides = array<i32>} : memref<64x64xf32, #tpu.memory_space<vmem>>, vector<8x32xf32>,
    %257 = tpu.concatenate %245, %254 in 1 : vector<8x32xf32>, vector<8x32xf32> -> vector<8x64xf32>
    %c56_89 = arith.constant 56 : index
    %c0_90 = arith.constant 0 : index
    %258 = vector.load %arg16[%c56_89, %c0_90] : memref<64x256xf32, #tpu.memory_space<vmem>>, vector<8x128xf32>
    %c0_91 = arith.constant 0 : index
    %c128_92 = arith.constant 128 : index
    %259 = vector.load %arg16[%c0_91, %c128_92] : memref<64x256xf32, #tpu.memory_space<vmem>>, vector<8x128xf32>
    %260 = tpu.concatenate %258, %259 in 1 : vector<8x128xf32>, vector<8x128xf32> -> vector<8x256xf32>
    %261 = arith.truncf %257 : vector<8x64xf32> to vector<8x64xbf16>
    %cst_93 = arith.constant dense<0.000000e+00> : vector<8x256xf32>
    %262 = tpu.matmul %261, %7, %cst_93 {dimension_numbers = #tpu.dot_dimension_numbers<[1], [0], [0], [1], [0, 0, 1, 1], [], []>} : vector<8x64xbf16>, vector<64x256xbf16>, vector<8x256xf32> -> vector<8x256xf32>
    %263 = arith.addf %260, %262 : vector<8x256xf32>
    %cst_94 = arith.constant 5.000000e-01 : f32
    %264 = vector.broadcast %cst_94 : f32 to vector<8x256xf32>
    %265 = arith.mulf %264, %263 : vector<8x256xf32>
    %266 = math.tanh %265 : vector<8x256xf32>
    %cst_95 = arith.constant 5.000000e-01 : f32
    %267 = vector.broadcast %cst_95 : f32 to vector<8x256xf32>
    %268 = arith.mulf %267, %266 : vector<8x256xf32>
    %cst_96 = arith.constant 5.000000e-01 : f32
    %269 = vector.broadcast %cst_96 : f32 to vector<8x256xf32>
    %270 = arith.addf %268, %269 : vector<8x256xf32>
    %271 = math.tanh %263 : vector<8x256xf32>
    %272 = vector.extract_strided_slice %270 {offsets = [0, 32], sizes = [8, 32], strides = [1, 1]} : vector<8x256xf32> to vector<8x32xf32>
    %273 = arith.mulf %272, %242 : vector<8x32xf32>
    %274 = vector.extract_strided_slice %270 {offsets = [0, 0], sizes = [8, 32], strides = [1, 1]} : vector<8x256xf32> to vector<8x32xf32>
    %275 = vector.extract_strided_slice %271 {offsets = [0, 64], sizes = [8, 32], strides = [1, 1]} : vector<8x256xf32> to vector<8x32xf32>
    %276 = arith.mulf %274, %275 : vector<8x32xf32>
    %277 = arith.addf %273, %276 : vector<8x32xf32>
    %278 = vector.extract_strided_slice %270 {offsets = [0, 96], sizes = [8, 32], strides = [1, 1]} : vector<8x256xf32> to vector<8x32xf32>
    %279 = math.tanh %277 : vector<8x32xf32>
    %280 = arith.mulf %278, %279 : vector<8x32xf32>
    %281 = vector.extract_strided_slice %270 {offsets = [0, 160], sizes = [8, 32], strides = [1, 1]} : vector<8x256xf32> to vector<8x32xf32>
    %282 = arith.mulf %281, %251 : vector<8x32xf32>
    %283 = vector.extract_strided_slice %270 {offsets = [0, 128], sizes = [8, 32], strides = [1, 1]} : vector<8x256xf32> to vector<8x32xf32>
    %284 = vector.extract_strided_slice %271 {offsets = [0, 192], sizes = [8, 32], strides = [1, 1]} : vector<8x256xf32> to vector<8x32xf32>
    %285 = arith.mulf %283, %284 : vector<8x32xf32>
    %286 = arith.addf %282, %285 : vector<8x32xf32>
    %287 = vector.extract_strided_slice %270 {offsets = [0, 224], sizes = [8, 32], strides = [1, 1]} : vector<8x256xf32> to vector<8x32xf32>
    %288 = math.tanh %286 : vector<8x32xf32>
    %289 = arith.mulf %287, %288 : vector<8x32xf32>
    %c56_97 = arith.constant 56 : index
    %c0_98 = arith.constant 0 : index
    %290 = vector.load %arg17[%c56_97, %c0_98] : memref<64x64xf32, #tpu.memory_space<vmem>>, vector<8x32xf32>
    tpu.vector_store %arg17[%c56_97, %c0_98], %280 {strides = array<i32>} : memref<64x64xf32, #tpu.memory_space<vmem>>, vector<8x32xf32>,
    %c0_99 = arith.constant 0 : index
    %c32_100 = arith.constant 32 : index
    %291 = vector.load %arg17[%c0_99, %c32_100] : memref<64x64xf32, #tpu.memory_space<vmem>>, vector<8x32xf32>
    tpu.vector_store %arg17[%c0_99, %c32_100], %289 {strides = array<i32>} : memref<64x64xf32, #tpu.memory_space<vmem>>, vector<8x32xf32>,
    %c56_101 = arith.constant 56 : index
    %c0_102 = arith.constant 0 : index
    %292 = vector.load %arg17[%c56_101, %c0_102] : memref<64x64xf32, #tpu.memory_space<vmem>>, vector<8x64xf32>
    %c0_103 = arith.constant 0 : index
    %c0_104 = arith.constant 0 : index
    %293 = vector.load %arg7[%c0_103, %c0_104] : memref<64x128xbf16, #tpu.memory_space<vmem>>, vector<64x128xbf16>
    %294 = arith.truncf %292 : vector<8x64xf32> to vector<8x64xbf16>
    %cst_105 = arith.constant dense<0.000000e+00> : vector<8x128xf32>
    %295 = tpu.matmul %294, %293, %cst_105 {dimension_numbers = #tpu.dot_dimension_numbers<[1], [0], [0], [1], [0, 0, 1, 1], [], []>} : vector<8x64xbf16>, vector<64x128xbf16>, vector<8x128xf32> -> vector<8x128xf32>
    %c0_106 = arith.constant 0 : index
    %c0_107 = arith.constant 0 : index
    %296 = vector.load %arg8[%c0_106, %c0_107] : memref<1x128xf32, #tpu.memory_space<vmem>>, vector<1x128xf32>
    %297 = vector.broadcast %296 : vector<1x128xf32> to vector<8x128xf32>
    %298 = arith.addf %295, %297 : vector<8x128xf32>
    %cst_108 = arith.constant 5.000000e-01 : f32
    %299 = vector.broadcast %cst_108 : f32 to vector<8x128xf32>
    %300 = arith.mulf %299, %298 : vector<8x128xf32>
    %301 = math.tanh %300 : vector<8x128xf32>
    %cst_109 = arith.constant 5.000000e-01 : f32
    %302 = vector.broadcast %cst_109 : f32 to vector<8x128xf32>
    %303 = arith.mulf %302, %301 : vector<8x128xf32>
    %cst_110 = arith.constant 5.000000e-01 : f32
    %304 = vector.broadcast %cst_110 : f32 to vector<8x128xf32>
    %305 = arith.addf %303, %304 : vector<8x128xf32>
    %306 = vector.extract_strided_slice %305 {offsets = [0, 0], sizes = [8, 32], strides = [1, 1]} : vector<8x128xf32> to vector<8x32xf32>
    %307 = vector.extract_strided_slice %298 {offsets = [0, 64], sizes = [8, 32], strides = [1, 1]} : vector<8x128xf32> to vector<8x32xf32>
    %308 = math.tanh %307 : vector<8x32xf32>
    %309 = arith.mulf %306, %308 : vector<8x32xf32>
    %310 = vector.extract_strided_slice %305 {offsets = [0, 96], sizes = [8, 32], strides = [1, 1]} : vector<8x128xf32> to vector<8x32xf32>
    %311 = math.tanh %309 : vector<8x32xf32>
    %312 = arith.mulf %310, %311 : vector<8x32xf32>
    %c32_111 = arith.constant 32 : index
    %c0_112 = arith.constant 0 : index
    %313 = vector.load %arg9[%c32_111, %c0_112] : memref<64x64xbf16, #tpu.memory_space<vmem>>, vector<32x64xbf16>
    %314 = arith.truncf %312 : vector<8x32xf32> to vector<8x32xbf16>
    %cst_113 = arith.constant dense<0.000000e+00> : vector<8x64xf32>
    %315 = tpu.matmul %314, %313, %cst_113 {dimension_numbers = #tpu.dot_dimension_numbers<[1], [0], [0], [1], [0, 0, 1, 1], [], []>} : vector<8x32xbf16>, vector<32x64xbf16>, vector<8x64xf32> -> vector<8x64xf32>
    %c0_114 = arith.constant 0 : index
    %c0_115 = arith.constant 0 : index
    %316 = vector.load %arg17[%c0_114, %c0_115] : memref<64x64xf32, #tpu.memory_space<vmem>>, vector<64x64xf32>
    %c0_116 = arith.constant 0 : index
    %c0_117 = arith.constant 0 : index
    %317 = vector.load %arg4[%c0_116, %c0_117] : memref<64x128xbf16, #tpu.memory_space<vmem>>, vector<64x128xbf16>
    %318 = arith.truncf %316 : vector<64x64xf32> to vector<64x64xbf16>
    %cst_118 = arith.constant dense<0.000000e+00> : vector<64x128xf32>
    %319 = tpu.matmul %318, %317, %cst_118 {dimension_numbers = #tpu.dot_dimension_numbers<[1], [0], [0], [1], [0, 0, 1, 1], [], []>} : vector<64x64xbf16>, vector<64x128xbf16>, vector<64x128xf32> -> vector<64x128xf32>
    %c0_119 = arith.constant 0 : index
    %c0_120 = arith.constant 0 : index
    %320 = vector.load %arg6[%c0_119, %c0_120] : memref<1x128xf32, #tpu.memory_space<vmem>>, vector<1x128xf32>
    %321 = vector.broadcast %320 : vector<1x128xf32> to vector<64x128xf32>
    %322 = arith.addf %319, %321 : vector<64x128xf32>
    %c0_121 = arith.constant 0 : index
    %c0_122 = arith.constant 0 : index
    %323 = vector.load %arg18[%c0_121, %c0_122] : memref<64x128xf32, #tpu.memory_space<vmem>>, vector<64x128xf32>
    tpu.vector_store %arg18[%c0_121, %c0_122], %322 {strides = array<i32>} : memref<64x128xf32, #tpu.memory_space<vmem>>, vector<64x128xf32>,
    %c0_123 = arith.constant 0 : index
    %c0_124 = arith.constant 0 : index
    %324 = vector.load %arg5[%c0_123, %c0_124] : memref<32x128xbf16, #tpu.memory_space<vmem>>, vector<32x128xbf16>
    %cst_125 = arith.constant 0.000000e+00 : f32
    %325 = vector.broadcast %cst_125 : f32 to vector<8x32xf32>
    %cst_126 = arith.constant 0.000000e+00 : f32
    %326 = vector.broadcast %cst_126 : f32 to vector<8x32xf32>
    %c0_127 = arith.constant 0 : index
    %c0_128 = arith.constant 0 : index
    %327 = vector.load %arg18[%c0_127, %c0_128] : memref<64x128xf32, #tpu.memory_space<vmem>>, vector<8x128xf32>
    %328 = arith.truncf %325 : vector<8x32xf32> to vector<8x32xbf16>
    %cst_129 = arith.constant dense<0.000000e+00> : vector<8x128xf32>
    %329 = tpu.matmul %328, %324, %cst_129 {dimension_numbers = #tpu.dot_dimension_numbers<[1], [0], [0], [1], [0, 0, 1, 1], [], []>} : vector<8x32xbf16>, vector<32x128xbf16>, vector<8x128xf32> -> vector<8x128xf32>
    %330 = arith.addf %327, %329 : vector<8x128xf32>
    %cst_130 = arith.constant 5.000000e-01 : f32
    %331 = vector.broadcast %cst_130 : f32 to vector<8x128xf32>
    %332 = arith.mulf %331, %330 : vector<8x128xf32>
    %333 = math.tanh %332 : vector<8x128xf32>
    %cst_131 = arith.constant 5.000000e-01 : f32
    %334 = vector.broadcast %cst_131 : f32 to vector<8x128xf32>
    %335 = arith.mulf %334, %333 : vector<8x128xf32>
    %cst_132 = arith.constant 5.000000e-01 : f32
    %336 = vector.broadcast %cst_132 : f32 to vector<8x128xf32>
    %337 = arith.addf %335, %336 : vector<8x128xf32>
    %338 = math.tanh %330 : vector<8x128xf32>
    %339 = vector.extract_strided_slice %337 {offsets = [0, 32], sizes = [8, 32], strides = [1, 1]} : vector<8x128xf32> to vector<8x32xf32>
    %340 = arith.mulf %339, %326 : vector<8x32xf32>
    %341 = vector.extract_strided_slice %337 {offsets = [0, 0], sizes = [8, 32], strides = [1, 1]} : vector<8x128xf32> to vector<8x32xf32>
    %342 = vector.extract_strided_slice %338 {offsets = [0, 64], sizes = [8, 32], strides = [1, 1]} : vector<8x128xf32> to vector<8x32xf32>
    %343 = arith.mulf %341, %342 : vector<8x32xf32>
    %344 = arith.addf %340, %343 : vector<8x32xf32>
    %345 = vector.extract_strided_slice %337 {offsets = [0, 96], sizes = [8, 32], strides = [1, 1]} : vector<8x128xf32> to vector<8x32xf32>
    %346 = math.tanh %344 : vector<8x32xf32>
    %347 = arith.mulf %345, %346 : vector<8x32xf32>
    %c8_133 = arith.constant 8 : index
    %c0_134 = arith.constant 0 : index
    %348 = vector.load %arg18[%c8_133, %c0_134] : memref<64x128xf32, #tpu.memory_space<vmem>>, vector<8x128xf32>
    %349 = arith.truncf %347 : vector<8x32xf32> to vector<8x32xbf16>
    %cst_135 = arith.constant dense<0.000000e+00> : vector<8x128xf32>
    %350 = tpu.matmul %349, %324, %cst_135 {dimension_numbers = #tpu.dot_dimension_numbers<[1], [0], [0], [1], [0, 0, 1, 1], [], []>} : vector<8x32xbf16>, vector<32x128xbf16>, vector<8x128xf32> -> vector<8x128xf32>
    %351 = arith.addf %348, %350 : vector<8x128xf32>
    %cst_136 = arith.constant 5.000000e-01 : f32
    %352 = vector.broadcast %cst_136 : f32 to vector<8x128xf32>
    %353 = arith.mulf %352, %351 : vector<8x128xf32>
    %354 = math.tanh %353 : vector<8x128xf32>
    %cst_137 = arith.constant 5.000000e-01 : f32
    %355 = vector.broadcast %cst_137 : f32 to vector<8x128xf32>
    %356 = arith.mulf %355, %354 : vector<8x128xf32>
    %cst_138 = arith.constant 5.000000e-01 : f32
    %357 = vector.broadcast %cst_138 : f32 to vector<8x128xf32>
    %358 = arith.addf %356, %357 : vector<8x128xf32>
    %359 = math.tanh %351 : vector<8x128xf32>
    %360 = vector.extract_strided_slice %358 {offsets = [0, 32], sizes = [8, 32], strides = [1, 1]} : vector<8x128xf32> to vector<8x32xf32>
    %361 = arith.mulf %360, %344 : vector<8x32xf32>
    %362 = vector.extract_strided_slice %358 {offsets = [0, 0], sizes = [8, 32], strides = [1, 1]} : vector<8x128xf32> to vector<8x32xf32>
    %363 = vector.extract_strided_slice %359 {offsets = [0, 64], sizes = [8, 32], strides = [1, 1]} : vector<8x128xf32> to vector<8x32xf32>
    %364 = arith.mulf %362, %363 : vector<8x32xf32>
    %365 = arith.addf %361, %364 : vector<8x32xf32>
    %366 = vector.extract_strided_slice %358 {offsets = [0, 96], sizes = [8, 32], strides = [1, 1]} : vector<8x128xf32> to vector<8x32xf32>
    %367 = math.tanh %365 : vector<8x32xf32>
    %368 = arith.mulf %366, %367 : vector<8x32xf32>
    %c16_139 = arith.constant 16 : index
    %c0_140 = arith.constant 0 : index
    %369 = vector.load %arg18[%c16_139, %c0_140] : memref<64x128xf32, #tpu.memory_space<vmem>>, vector<8x128xf32>
    %370 = arith.truncf %368 : vector<8x32xf32> to vector<8x32xbf16>
    %cst_141 = arith.constant dense<0.000000e+00> : vector<8x128xf32>
    %371 = tpu.matmul %370, %324, %cst_141 {dimension_numbers = #tpu.dot_dimension_numbers<[1], [0], [0], [1], [0, 0, 1, 1], [], []>} : vector<8x32xbf16>, vector<32x128xbf16>, vector<8x128xf32> -> vector<8x128xf32>
    %372 = arith.addf %369, %371 : vector<8x128xf32>
    %cst_142 = arith.constant 5.000000e-01 : f32
    %373 = vector.broadcast %cst_142 : f32 to vector<8x128xf32>
    %374 = arith.mulf %373, %372 : vector<8x128xf32>
    %375 = math.tanh %374 : vector<8x128xf32>
    %cst_143 = arith.constant 5.000000e-01 : f32
    %376 = vector.broadcast %cst_143 : f32 to vector<8x128xf32>
    %377 = arith.mulf %376, %375 : vector<8x128xf32>
    %cst_144 = arith.constant 5.000000e-01 : f32
    %378 = vector.broadcast %cst_144 : f32 to vector<8x128xf32>
    %379 = arith.addf %377, %378 : vector<8x128xf32>
    %380 = math.tanh %372 : vector<8x128xf32>
    %381 = vector.extract_strided_slice %379 {offsets = [0, 32], sizes = [8, 32], strides = [1, 1]} : vector<8x128xf32> to vector<8x32xf32>
    %382 = arith.mulf %381, %365 : vector<8x32xf32>
    %383 = vector.extract_strided_slice %379 {offsets = [0, 0], sizes = [8, 32], strides = [1, 1]} : vector<8x128xf32> to vector<8x32xf32>
    %384 = vector.extract_strided_slice %380 {offsets = [0, 64], sizes = [8, 32], strides = [1, 1]} : vector<8x128xf32> to vector<8x32xf32>
    %385 = arith.mulf %383, %384 : vector<8x32xf32>
    %386 = arith.addf %382, %385 : vector<8x32xf32>
    %387 = vector.extract_strided_slice %379 {offsets = [0, 96], sizes = [8, 32], strides = [1, 1]} : vector<8x128xf32> to vector<8x32xf32>
    %388 = math.tanh %386 : vector<8x32xf32>
    %389 = arith.mulf %387, %388 : vector<8x32xf32>
    %c24_145 = arith.constant 24 : index
    %c0_146 = arith.constant 0 : index
    %390 = vector.load %arg18[%c24_145, %c0_146] : memref<64x128xf32, #tpu.memory_space<vmem>>, vector<8x128xf32>
    %391 = arith.truncf %389 : vector<8x32xf32> to vector<8x32xbf16>
    %cst_147 = arith.constant dense<0.000000e+00> : vector<8x128xf32>
    %392 = tpu.matmul %391, %324, %cst_147 {dimension_numbers = #tpu.dot_dimension_numbers<[1], [0], [0], [1], [0, 0, 1, 1], [], []>} : vector<8x32xbf16>, vector<32x128xbf16>, vector<8x128xf32> -> vector<8x128xf32>
    %393 = arith.addf %390, %392 : vector<8x128xf32>
    %cst_148 = arith.constant 5.000000e-01 : f32
    %394 = vector.broadcast %cst_148 : f32 to vector<8x128xf32>
    %395 = arith.mulf %394, %393 : vector<8x128xf32>
    %396 = math.tanh %395 : vector<8x128xf32>
    %cst_149 = arith.constant 5.000000e-01 : f32
    %397 = vector.broadcast %cst_149 : f32 to vector<8x128xf32>
    %398 = arith.mulf %397, %396 : vector<8x128xf32>
    %cst_150 = arith.constant 5.000000e-01 : f32
    %399 = vector.broadcast %cst_150 : f32 to vector<8x128xf32>
    %400 = arith.addf %398, %399 : vector<8x128xf32>
    %401 = math.tanh %393 : vector<8x128xf32>
    %402 = vector.extract_strided_slice %400 {offsets = [0, 32], sizes = [8, 32], strides = [1, 1]} : vector<8x128xf32> to vector<8x32xf32>
    %403 = arith.mulf %402, %386 : vector<8x32xf32>
    %404 = vector.extract_strided_slice %400 {offsets = [0, 0], sizes = [8, 32], strides = [1, 1]} : vector<8x128xf32> to vector<8x32xf32>
    %405 = vector.extract_strided_slice %401 {offsets = [0, 64], sizes = [8, 32], strides = [1, 1]} : vector<8x128xf32> to vector<8x32xf32>
    %406 = arith.mulf %404, %405 : vector<8x32xf32>
    %407 = arith.addf %403, %406 : vector<8x32xf32>
    %408 = vector.extract_strided_slice %400 {offsets = [0, 96], sizes = [8, 32], strides = [1, 1]} : vector<8x128xf32> to vector<8x32xf32>
    %409 = math.tanh %407 : vector<8x32xf32>
    %410 = arith.mulf %408, %409 : vector<8x32xf32>
    %c32_151 = arith.constant 32 : index
    %c0_152 = arith.constant 0 : index
    %411 = vector.load %arg18[%c32_151, %c0_152] : memref<64x128xf32, #tpu.memory_space<vmem>>, vector<8x128xf32>
    %412 = arith.truncf %410 : vector<8x32xf32> to vector<8x32xbf16>
    %cst_153 = arith.constant dense<0.000000e+00> : vector<8x128xf32>
    %413 = tpu.matmul %412, %324, %cst_153 {dimension_numbers = #tpu.dot_dimension_numbers<[1], [0], [0], [1], [0, 0, 1, 1], [], []>} : vector<8x32xbf16>, vector<32x128xbf16>, vector<8x128xf32> -> vector<8x128xf32>
    %414 = arith.addf %411, %413 : vector<8x128xf32>
    %cst_154 = arith.constant 5.000000e-01 : f32
    %415 = vector.broadcast %cst_154 : f32 to vector<8x128xf32>
    %416 = arith.mulf %415, %414 : vector<8x128xf32>
    %417 = math.tanh %416 : vector<8x128xf32>
    %cst_155 = arith.constant 5.000000e-01 : f32
    %418 = vector.broadcast %cst_155 : f32 to vector<8x128xf32>
    %419 = arith.mulf %418, %417 : vector<8x128xf32>
    %cst_156 = arith.constant 5.000000e-01 : f32
    %420 = vector.broadcast %cst_156 : f32 to vector<8x128xf32>
    %421 = arith.addf %419, %420 : vector<8x128xf32>
    %422 = math.tanh %414 : vector<8x128xf32>
    %423 = vector.extract_strided_slice %421 {offsets = [0, 32], sizes = [8, 32], strides = [1, 1]} : vector<8x128xf32> to vector<8x32xf32>
    %424 = arith.mulf %423, %407 : vector<8x32xf32>
    %425 = vector.extract_strided_slice %421 {offsets = [0, 0], sizes = [8, 32], strides = [1, 1]} : vector<8x128xf32> to vector<8x32xf32>
    %426 = vector.extract_strided_slice %422 {offsets = [0, 64], sizes = [8, 32], strides = [1, 1]} : vector<8x128xf32> to vector<8x32xf32>
    %427 = arith.mulf %425, %426 : vector<8x32xf32>
    %428 = arith.addf %424, %427 : vector<8x32xf32>
    %429 = vector.extract_strided_slice %421 {offsets = [0, 96], sizes = [8, 32], strides = [1, 1]} : vector<8x128xf32> to vector<8x32xf32>
    %430 = math.tanh %428 : vector<8x32xf32>
    %431 = arith.mulf %429, %430 : vector<8x32xf32>
    %c40_157 = arith.constant 40 : index
    %c0_158 = arith.constant 0 : index
    %432 = vector.load %arg18[%c40_157, %c0_158] : memref<64x128xf32, #tpu.memory_space<vmem>>, vector<8x128xf32>
    %433 = arith.truncf %431 : vector<8x32xf32> to vector<8x32xbf16>
    %cst_159 = arith.constant dense<0.000000e+00> : vector<8x128xf32>
    %434 = tpu.matmul %433, %324, %cst_159 {dimension_numbers = #tpu.dot_dimension_numbers<[1], [0], [0], [1], [0, 0, 1, 1], [], []>} : vector<8x32xbf16>, vector<32x128xbf16>, vector<8x128xf32> -> vector<8x128xf32>
    %435 = arith.addf %432, %434 : vector<8x128xf32>
    %cst_160 = arith.constant 5.000000e-01 : f32
    %436 = vector.broadcast %cst_160 : f32 to vector<8x128xf32>
    %437 = arith.mulf %436, %435 : vector<8x128xf32>
    %438 = math.tanh %437 : vector<8x128xf32>
    %cst_161 = arith.constant 5.000000e-01 : f32
    %439 = vector.broadcast %cst_161 : f32 to vector<8x128xf32>
    %440 = arith.mulf %439, %438 : vector<8x128xf32>
    %cst_162 = arith.constant 5.000000e-01 : f32
    %441 = vector.broadcast %cst_162 : f32 to vector<8x128xf32>
    %442 = arith.addf %440, %441 : vector<8x128xf32>
    %443 = math.tanh %435 : vector<8x128xf32>
    %444 = vector.extract_strided_slice %442 {offsets = [0, 32], sizes = [8, 32], strides = [1, 1]} : vector<8x128xf32> to vector<8x32xf32>
    %445 = arith.mulf %444, %428 : vector<8x32xf32>
    %446 = vector.extract_strided_slice %442 {offsets = [0, 0], sizes = [8, 32], strides = [1, 1]} : vector<8x128xf32> to vector<8x32xf32>
    %447 = vector.extract_strided_slice %443 {offsets = [0, 64], sizes = [8, 32], strides = [1, 1]} : vector<8x128xf32> to vector<8x32xf32>
    %448 = arith.mulf %446, %447 : vector<8x32xf32>
    %449 = arith.addf %445, %448 : vector<8x32xf32>
    %450 = vector.extract_strided_slice %442 {offsets = [0, 96], sizes = [8, 32], strides = [1, 1]} : vector<8x128xf32> to vector<8x32xf32>
    %451 = math.tanh %449 : vector<8x32xf32>
    %452 = arith.mulf %450, %451 : vector<8x32xf32>
    %c48_163 = arith.constant 48 : index
    %c0_164 = arith.constant 0 : index
    %453 = vector.load %arg18[%c48_163, %c0_164] : memref<64x128xf32, #tpu.memory_space<vmem>>, vector<8x128xf32>
    %454 = arith.truncf %452 : vector<8x32xf32> to vector<8x32xbf16>
    %cst_165 = arith.constant dense<0.000000e+00> : vector<8x128xf32>
    %455 = tpu.matmul %454, %324, %cst_165 {dimension_numbers = #tpu.dot_dimension_numbers<[1], [0], [0], [1], [0, 0, 1, 1], [], []>} : vector<8x32xbf16>, vector<32x128xbf16>, vector<8x128xf32> -> vector<8x128xf32>
    %456 = arith.addf %453, %455 : vector<8x128xf32>
    %cst_166 = arith.constant 5.000000e-01 : f32
    %457 = vector.broadcast %cst_166 : f32 to vector<8x128xf32>
    %458 = arith.mulf %457, %456 : vector<8x128xf32>
    %459 = math.tanh %458 : vector<8x128xf32>
    %cst_167 = arith.constant 5.000000e-01 : f32
    %460 = vector.broadcast %cst_167 : f32 to vector<8x128xf32>
    %461 = arith.mulf %460, %459 : vector<8x128xf32>
    %cst_168 = arith.constant 5.000000e-01 : f32
    %462 = vector.broadcast %cst_168 : f32 to vector<8x128xf32>
    %463 = arith.addf %461, %462 : vector<8x128xf32>
    %464 = math.tanh %456 : vector<8x128xf32>
    %465 = vector.extract_strided_slice %463 {offsets = [0, 32], sizes = [8, 32], strides = [1, 1]} : vector<8x128xf32> to vector<8x32xf32>
    %466 = arith.mulf %465, %449 : vector<8x32xf32>
    %467 = vector.extract_strided_slice %463 {offsets = [0, 0], sizes = [8, 32], strides = [1, 1]} : vector<8x128xf32> to vector<8x32xf32>
    %468 = vector.extract_strided_slice %464 {offsets = [0, 64], sizes = [8, 32], strides = [1, 1]} : vector<8x128xf32> to vector<8x32xf32>
    %469 = arith.mulf %467, %468 : vector<8x32xf32>
    %470 = arith.addf %466, %469 : vector<8x32xf32>
    %471 = vector.extract_strided_slice %463 {offsets = [0, 96], sizes = [8, 32], strides = [1, 1]} : vector<8x128xf32> to vector<8x32xf32>
    %472 = math.tanh %470 : vector<8x32xf32>
    %473 = arith.mulf %471, %472 : vector<8x32xf32>
    %c56_169 = arith.constant 56 : index
    %c0_170 = arith.constant 0 : index
    %474 = vector.load %arg18[%c56_169, %c0_170] : memref<64x128xf32, #tpu.memory_space<vmem>>, vector<8x128xf32>
    %475 = arith.truncf %473 : vector<8x32xf32> to vector<8x32xbf16>
    %cst_171 = arith.constant dense<0.000000e+00> : vector<8x128xf32>
    %476 = tpu.matmul %475, %324, %cst_171 {dimension_numbers = #tpu.dot_dimension_numbers<[1], [0], [0], [1], [0, 0, 1, 1], [], []>} : vector<8x32xbf16>, vector<32x128xbf16>, vector<8x128xf32> -> vector<8x128xf32>
    %477 = arith.addf %474, %476 : vector<8x128xf32>
    %cst_172 = arith.constant 5.000000e-01 : f32
    %478 = vector.broadcast %cst_172 : f32 to vector<8x128xf32>
    %479 = arith.mulf %478, %477 : vector<8x128xf32>
    %480 = math.tanh %479 : vector<8x128xf32>
    %cst_173 = arith.constant 5.000000e-01 : f32
    %481 = vector.broadcast %cst_173 : f32 to vector<8x128xf32>
    %482 = arith.mulf %481, %480 : vector<8x128xf32>
    %cst_174 = arith.constant 5.000000e-01 : f32
    %483 = vector.broadcast %cst_174 : f32 to vector<8x128xf32>
    %484 = arith.addf %482, %483 : vector<8x128xf32>
    %485 = math.tanh %477 : vector<8x128xf32>
    %486 = vector.extract_strided_slice %484 {offsets = [0, 32], sizes = [8, 32], strides = [1, 1]} : vector<8x128xf32> to vector<8x32xf32>
    %487 = arith.mulf %486, %470 : vector<8x32xf32>
    %488 = vector.extract_strided_slice %484 {offsets = [0, 0], sizes = [8, 32], strides = [1, 1]} : vector<8x128xf32> to vector<8x32xf32>
    %489 = vector.extract_strided_slice %485 {offsets = [0, 64], sizes = [8, 32], strides = [1, 1]} : vector<8x128xf32> to vector<8x32xf32>
    %490 = arith.mulf %488, %489 : vector<8x32xf32>
    %491 = arith.addf %487, %490 : vector<8x32xf32>
    %492 = vector.extract_strided_slice %484 {offsets = [0, 96], sizes = [8, 32], strides = [1, 1]} : vector<8x128xf32> to vector<8x32xf32>
    %493 = math.tanh %491 : vector<8x32xf32>
    %494 = arith.mulf %492, %493 : vector<8x32xf32>
    %c0_175 = arith.constant 0 : index
    %c0_176 = arith.constant 0 : index
    %495 = vector.load %arg9[%c0_175, %c0_176] : memref<64x64xbf16, #tpu.memory_space<vmem>>, vector<32x64xbf16>
    %496 = arith.truncf %494 : vector<8x32xf32> to vector<8x32xbf16>
    %cst_177 = arith.constant dense<0.000000e+00> : vector<8x64xf32>
    %497 = tpu.matmul %496, %495, %cst_177 {dimension_numbers = #tpu.dot_dimension_numbers<[1], [0], [0], [1], [0, 0, 1, 1], [], []>} : vector<8x32xbf16>, vector<32x64xbf16>, vector<8x64xf32> -> vector<8x64xf32>
    %498 = arith.addf %497, %315 : vector<8x64xf32>
    %c0_178 = arith.constant 0 : index
    %c0_179 = arith.constant 0 : index
    %499 = vector.load %arg10[%c0_178, %c0_179] : memref<1x64xf32, #tpu.memory_space<vmem>>, vector<1x64xf32>
    %500 = vector.broadcast %499 : vector<1x64xf32> to vector<8x64xf32>
    %501 = arith.addf %498, %500 : vector<8x64xf32>
    %cst_180 = arith.constant 0.000000e+00 : f32
    %502 = vector.broadcast %cst_180 : f32 to vector<8x64xf32>
    %503 = arith.maximumf %501, %502 : vector<8x64xf32>
    %c0_181 = arith.constant 0 : index
    %c0_182 = arith.constant 0 : index
    %504 = vector.load %arg11[%c0_181, %c0_182] : memref<64x32xbf16, #tpu.memory_space<vmem>>, vector<64x32xbf16>
    %505 = arith.truncf %503 : vector<8x64xf32> to vector<8x64xbf16>
    %cst_183 = arith.constant dense<0.000000e+00> : vector<8x32xf32>
    %506 = tpu.matmul %505, %504, %cst_183 {dimension_numbers = #tpu.dot_dimension_numbers<[1], [0], [0], [1], [0, 0, 1, 1], [], []>} : vector<8x64xbf16>, vector<64x32xbf16>, vector<8x32xf32> -> vector<8x32xf32>
    %c0_184 = arith.constant 0 : index
    %c0_185 = arith.constant 0 : index
    %507 = vector.load %arg12[%c0_184, %c0_185] : memref<1x32xf32, #tpu.memory_space<vmem>>, vector<1x32xf32>
    %508 = vector.broadcast %507 : vector<1x32xf32> to vector<8x32xf32>
    %509 = arith.addf %506, %508 : vector<8x32xf32>
    %cst_186 = arith.constant 0.000000e+00 : f32
    %510 = vector.broadcast %cst_186 : f32 to vector<8x32xf32>
    %511 = arith.maximumf %509, %510 : vector<8x32xf32>
    %c0_187 = arith.constant 0 : index
    %c0_188 = arith.constant 0 : index
    %512 = vector.load %arg13[%c0_187, %c0_188] : memref<32x1xbf16, #tpu.memory_space<vmem>>, vector<32x1xbf16>
    %513 = arith.truncf %511 : vector<8x32xf32> to vector<8x32xbf16>
    %cst_189 = arith.constant dense<0.000000e+00> : vector<8x1xf32>
    %514 = tpu.matmul %513, %512, %cst_189 {dimension_numbers = #tpu.dot_dimension_numbers<[1], [0], [0], [1], [0, 0, 1, 1], [], []>} : vector<8x32xbf16>, vector<32x1xbf16>, vector<8x1xf32> -> vector<8x1xf32>
    %c0_190 = arith.constant 0 : index
    %c0_191 = arith.constant 0 : index
    %515 = vector.load %arg14[%c0_190, %c0_191] : memref<1x1xf32, #tpu.memory_space<vmem>>, vector<1x1xf32>
    %516 = vector.broadcast %515 : vector<1x1xf32> to vector<8x1xf32>
    %517 = arith.addf %514, %516 : vector<8x1xf32>
    %c0_192 = arith.constant 0 : index
    %c0_193 = arith.constant 0 : index
    %518 = vector.load %arg15[%c0_192, %c0_193] : memref<8x1xf32, #tpu.memory_space<vmem>>, vector<8x1xf32>
    tpu.vector_store %arg15[%c0_192, %c0_193], %517 {strides = array<i32>} : memref<8x1xf32, #tpu.memory_space<vmem>>, vector<8x1xf32>,
    return
  }
}

</mosaic_0001>

<bundles_post_ra>
// kernel: lstm_model_forward.1
= control target key start
LH: loop header
LB: loop body
LE: loop exit
PB: predicated region body
PF: predicated region fallthrough
CT: control target
= control target key end

     0   :  { %v2637_v1 = vmov 0   ;;  %vm105_vm0 = vcmask 130048   ;;  %v2638_v13 = vmov 0.0|0.0   ;;  %v65_v16 = vlaneseq  ;;  %s2643_s17 = smov 96   ;;  %s3248_s1 = inlined_call_operand.vmem [shape: bf16[16,256], index: 1, kind: input, shape index: {}]   ;;  %s3249_s3 = inlined_call_operand.vmem [shape: bf16[64,256], index: 3, kind: input, shape index: {}]   ;;  %s3250_s0 = inlined_call_operand.vmem [shape: bf16[64,16], index: 0, kind: input, shape index: {}]   ;;  %s3251_s2 = inlined_call_operand.vmem [shape: f32[1,256], index: 2, kind: input, shape index: {}]   ;;  %s3252_s7 = inlined_call_operand.vmem [shape: bf16[64,128], index: 7, kind: input, shape index: {}]   ;;  %s3253_s4 = inlined_call_operand.vmem [shape: bf16[64,128], index: 4, kind: input, shape index: {}]   ;;  %s3254_s8 = inlined_call_operand.vmem [shape: f32[1,128], index: 8, kind: input, shape index: {}]   ;;  %s3255_s9 = inlined_call_operand.vmem [shape: bf16[64,64], index: 9, kind: input, shape index: {}]   ;;  %s3256_s6 = inlined_call_operand.vmem [shape: f32[1,128], index: 6, kind: input, shape index: {}]   ;;  %s3257_s5 = inlined_call_operand.vmem [shape: bf16[32,128], index: 5, kind: input, shape index: {}]   ;;  %s3258_s11 = inlined_call_operand.vmem [shape: bf16[64,32], index: 11, kind: input, shape index: {}]   ;;  %s3259_s13 = inlined_call_operand.vmem [shape: bf16[32,1], index: 13, kind: input, shape index: {}]   ;;  %s3260_s10 = inlined_call_operand.vmem [shape: f32[1,64], index: 10, kind: input, shape index: {}]   ;;  %s3261_s14 = inlined_call_operand.<no memory space> [shape: f32[1,1], index: 14, kind: input, shape index: {}]   ;;  %s3262_s12 = inlined_call_operand.vmem [shape: f32[1,32], index: 12, kind: input, shape index: {}]   ;;  %s3263_s15 = inlined_call_operand.vmem [shape: f32[8,1], index: 15, kind: output, shape index: {}]  }
   0x1   :  { %v2448_v0 = vld [vmem:[%s3248_s1 + $0x4] ss:$8 sps:$4 sm:$0xff]   ;;  %150 = vmatprep.mubr.bf16.mxu0 %v2637_v1  ;;  %294 = vmatprep.mubr.bf16.mxu1 %v2637_v1  ;;  %v2732_v2 = vld [vmem:[%s3249_s3 + $0x34] ss:$8 sps:$4 sm:$0xff]   ;;  %v2452_v3 = vld [vmem:[%s3248_s1] ss:$8 sps:$4 sm:$0xff]  }
   0x2   :  { %132 = vmatprep.subr.bf16.mxu0 %v2448_v0  ;;  %v2740_v4 = vld [vmem:[%s3249_s3 + $0x30] ss:$8 sps:$4 sm:$0xff]   ;;  %270 = vmatprep.subr.bf16.mxu1 %v2732_v2  ;;  %v2454_v5 = vld [vmem:[%s3250_s0] sm:$0xff]   ;;  %v2760_v8 = vld [vmem:[%s3249_s3 + $0x14] ss:$8 sps:$4 sm:$0xff]   ;;  %v66_v17 = vshrl.u32 %v65_v16, 7 }
   0x3   :  { %133 = vmatpush1.bf16.msra.mxu0 %v2452_v3  ;;  %271 = vmatpush1.bf16.msra.mxu1 %v2740_v4  ;;  %v2750_v6 = vld [vmem:[%s3249_s3 + $0x24] ss:$8 sps:$4 sm:$0xff]   ;;  %v2755_v7 = vld [vmem:[%s3249_s3 + $0x20] ss:$8 sps:$4 sm:$0xff]   ;;  %v2769_v9 = vld [vmem:[%s3249_s3 + $0x10] ss:$8 sps:$4 sm:$0xff]  }
   0x4   :  { %480 = vmatprep.subr.bf16.mxu0 %v2732_v2  ;;  %272 = vmatprep.subr.bf16.mxu1 %v2750_v6  ;;  %v2776_v10 = vld [vmem:[%s3249_s3 + $0x4] ss:$8 sps:$4 sm:$0xff]   ;;  %v2787_v12 = vld [vmem:[%s3249_s3] ss:$8 sps:$4 sm:$0xff]   ;;  %v2465_v14 = vld [vmem:[%s3250_s0 + $0x10] sm:$0xff]   ;;  %v71_v18 = vsub.s32 1, %v66_v17 }
   0x5   :  { %v2461_v11 = vld [vmem:[%s3250_s0 + $0x8] sm:$0xff]   ;;  %v2466_v15 = vld [vmem:[%s3250_s0 + $0x18] sm:$0xff]   ;;  %v63_v19 = vld [vmem:[%s3251_s2] sm:$0x3]  ;;  %v67_v20 = vsub.s32 0, %v66_v17  ;;  %s2639_s0 = smov 64  }
   0x6   :  { %2202 = vmatmul.mubr.msk.bf16.vlgmr.msra.gmra.mxu0 %vm105_vm0, %v2454_v5  ;;  %v72_v21 = vrot.slane %v63_v19, %v71_v18  ;;  %s2640_s2 = smov 32   ;;  %vm353_vm1 = vcmask 261120   ;;  %vm359_vm2 = vcmask 523520   ;;  %vm258_vm3 = vcmask 523264  }
   0x7   :  { %273 = vmatpush1.bf16.msra.mxu1 %v2755_v7  ;;  %160 = vmatprep.mubr.bf16.mxu0 %v2637_v1  ;;  %v68_v24 = vrot.slane %v63_v19, %v67_v20  ;;  %vm2642_vm4 = vmmov 0   ;;  %vm2190_vm5 = vcmask 7168  }
   0x8   :  { %274 = vmatprep.subr.bf16.mxu1 %v2760_v8  ;;  %481 = vmatpush1.bf16.msra.mxu0 %v2740_v4 }
   0x9   :  { %482 = vmatprep.subr.bf16.mxu0 %v2750_v6 }
   0xb   :  { %275 = vmatpush1.bf16.msra.mxu1 %v2769_v9 }
   0xc   :  { %276 = vmatprep.subr.bf16.mxu1 %v2776_v10  ;;  %483 = vmatpush1.bf16.msra.mxu0 %v2755_v7 }
   0xd   :  { %484 = vmatprep.subr.bf16.mxu0 %v2760_v8 }
   0xe   :  { %2203 = vmatmul.mubr.msk.bf16.gmra.mxu0 %vm105_vm0, %v2461_v11 }
   0xf   :  { %277 = vmatpush1.bf16.msra.mxu1 %v2787_v12  ;;  %170 = vmatprep.mubr.bf16.mxu0 %v2637_v1 }
  0x10   :  { %376 = vmatprep.subr.bf16.mxu1 %v2732_v2  ;;  %485 = vmatpush1.bf16.msra.mxu0 %v2769_v9 }
  0x11   :  { %486 = vmatprep.subr.bf16.mxu0 %v2776_v10 }
  0x12   :  { %295 = vmatmul.mubr.bf16.vlgmr.msra.gmra.mxu1 %v2638_v13 }
  0x13   :  { %377 = vmatpush1.bf16.msra.mxu1 %v2740_v4  ;;  %400 = vmatprep.mubr.bf16.mxu1 %v2637_v1 }
  0x14   :  { %378 = vmatprep.subr.bf16.mxu1 %v2750_v6  ;;  %487 = vmatpush1.bf16.msra.mxu0 %v2787_v12 }
  0x15   :  { %688 = vmatprep.subr.bf16.mxu0 %v2732_v2 }
  0x16   :  { %2204 = vmatmul.mubr.msk.bf16.gmra.mxu0 %vm105_vm0, %v2465_v14 }
  0x17   :  { %180 = vmatprep.mubr.bf16.mxu0 %v2637_v1  ;;  %379 = vmatpush1.bf16.msra.mxu1 %v2755_v7 }
  0x18   :  { %380 = vmatprep.subr.bf16.mxu1 %v2760_v8 }
  0x1b   :  { %381 = vmatpush1.bf16.msra.mxu1 %v2769_v9 }
  0x1c   :  { %382 = vmatprep.subr.bf16.mxu1 %v2776_v10 }
  0x1e   :  { %2205 = vmatmul.mubr.msk.bf16.gmra.mxu0 %vm105_vm0, %v2466_v15 }
  0x1f   :  { %383 = vmatpush1.bf16.msra.mxu1 %v2787_v12  ;;  %504 = vmatprep.mubr.bf16.mxu0 %v2637_v1 }
  0x20   :  { %584 = vmatprep.subr.bf16.mxu1 %v2732_v2 }
  0xc6   :  { %v152_v22 = vpop.f32.mrf.mxu0 }
  0xc7   :  { %v153_v33 = vadd.f32 %v152_v22, %v68_v24 }
  0xc8   :  { %v154_v23 = vpop.f32.mrf.mxu0 }
  0xc9   :  { %v2822_v25 = vadd.f32 %v154_v23, %v72_v21 }
  0xca   :  { %v156_v26 = vpop.f32.mrf.mxu0 }
  0xcb   :  { %v2824_v27 = vadd.f32 %v156_v26, %v68_v24 }
  0xcc   :  { %v158_v28 = vpop.f32.mrf.mxu0 }
  0xcd   :  { %v2826_v29 = vadd.f32 %v158_v28, %v72_v21 }
  0xce   :  { %v162_v30 = vpop.f32.mrf.mxu0 }
  0xcf   :  { %v2828_v31 = vadd.f32 %v162_v30, %v68_v24 }
  0xd0   :  { %v164_v32 = vpop.f32.mrf.mxu0 }
  0xd1   :  { %v2830_v34 = vadd.f32 %v164_v32, %v72_v21 }
  0xd2   :  { %v166_v35 = vpop.f32.mrf.mxu0  ;;  %v296_v36 = vpop.f32.mrf.mxu1 }
  0xd3   :  { %v2832_v37 = vadd.f32 %v166_v35, %v68_v24  ;;  %v303_v38 = vadd.f32 %v296_v36, %v153_v33 }
  0xd4   :  { %v168_v39 = vpop.f32.mrf.mxu0  ;;  %v298_v40 = vpop.f32.mrf.mxu1 }
  0xd5   :  { %2487 = vtanh.f32 %v303_v38  ;;  %v2834_v41 = vadd.f32 %v168_v39, %v72_v21  ;;  %v305_v63 = vmul.f32 0.5, %v303_v38 }
  0xd6   :  { %v172_v42 = vpop.f32.mrf.mxu0  ;;  %v300_v43 = vpop.f32.mrf.mxu1 }
  0xd7   :  { %v2836_v44 = vadd.f32 %v172_v42, %v68_v24 }
  0xd8   :  { %v174_v45 = vpop.f32.mrf.mxu0  ;;  %v301_v46 = vpop.f32.mrf.mxu1 }
  0xd9   :  { %v2838_v47 = vadd.f32 %v174_v45, %v72_v21 }
  0xda   :  { %v176_v48 = vpop.f32.mrf.mxu0 }
  0xdb   :  { %v2840_v49 = vadd.f32 %v176_v48, %v68_v24 }
  0xdc   :  { %v178_v50 = vpop.f32.mrf.mxu0 }
  0xdd   :  { %v2842_v51 = vadd.f32 %v178_v50, %v72_v21 }
  0xde   :  { %v182_v52 = vpop.f32.mrf.mxu0 }
  0xdf   :  { %v2844_v53 = vadd.f32 %v182_v52, %v68_v24 }
  0xe0   :  { %v184_v54 = vpop.f32.mrf.mxu0 }
  0xe1   :  { %v2846_v55 = vadd.f32 %v184_v54, %v72_v21 }
  0xe2   :  { %v2488_v56 = vpop.eup %2487  ;;  %v186_v57 = vpop.f32.mrf.mxu0 }
  0xe3   :  { %v2848_v58 = vadd.f32 %v186_v57, %v68_v24  ;;  %317 = vrot.lane.b32.xlu0 %v2488_v56, %s2639_s0 }
  0xe4   :  { %v188_v59 = vpop.f32.mrf.mxu0 }
  0xe5   :  { %v189_v60 = vadd.f32 %v188_v59, %v72_v21 }
  0xe7   :  { %v304_v61 = vadd.f32 %v298_v40, %v189_v60 }
  0xe9   :  { %2489 = vtanh.f32 %v304_v61  ;;  %v306_v3 = vmul.f32 0.5, %v304_v61 }
  0xea   :  { %2491 = vtanh.f32 %v305_v63 }
  0xeb   :  { %2493 = vtanh.f32 %v306_v3 }
  0xf6   :  { %v2490_v62 = vpop.eup %2489 }
  0xf7   :  { %334 = vrot.lane.b32.xlu0 %v2490_v62, %s2639_s0  ;;  %v2492_v0 = vpop.eup %2491 }
  0xf8   :  { %v309_v5 = vmul.f32 0.5, %v2492_v0  ;;  %v2494_v15 = vpop.eup %2493 }
  0xf9   :  { %v310_v16 = vmul.f32 0.5, %v2494_v15 }
  0xfa   :  { %v311_v11 = vadd.f32 0.5, %v309_v5 }
  0xfb   :  { %v312_v17 = vadd.f32 0.5, %v310_v16 }
  0xfc   :  { %v315_v20 = vmul.f32 0.0, %v311_v11 }
  0xfd   :  { %v332_v24 = vmul.f32 0.0, %v312_v17 }
 0x155   :  { %v318_v13 = vpop.permute.xlu0 %317 }
 0x156   :  { %v320_v14 = vmul.f32 %v318_v13, %v311_v11 }
 0x158   :  { %322 = vrot.lane.b32.xlu1 %v320_v14, %s2640_s2 }
 0x169   :  { %v335_v18 = vpop.permute.xlu0 %334 }
 0x16a   :  { %v337_v19 = vmul.f32 %v335_v18, %v312_v17 }
 0x16c   :  { %339 = vrot.lane.b32.xlu1 %v337_v19, %s2640_s2 }
 0x1ca   :  { %v323_v21 = vpop.permute.xlu1 %322 }
 0x1cb   :  { %v2854_v22 = vadd.f32 %v323_v21, %v315_v20 }
 0x1cd   :  { %2495 = vtanh.f32 %v2854_v22 }
 0x1da   :  { %v2496_v23 = vpop.eup %2495 }
 0x1db   :  { %328 = vrot.lane.b32.xlu0 %v2496_v23, %s2639_s0 }
 0x1de   :  { %v340_v26 = vpop.permute.xlu1 %339 }
 0x1df   :  { %v342_v28 = vadd.f32 %v340_v26, %v332_v24 }
 0x1e1   :  { %2497 = vtanh.f32 %v342_v28 }
 0x1ee   :  { %v2498_v30 = vpop.eup %2497 }
 0x1ef   :  { %345 = vrot.lane.b32.xlu1 %v2498_v30, %s2639_s0 }
 0x24d   :  { %v329_v32 = vpop.permute.xlu0 %328 }
 0x24e   :  { %v331_v33 = vmul.f32 %v329_v32, %v311_v11 }
 0x250   :  { %350 = vrot.lane.b32.xlu0 %v331_v33, %s2640_s2 }
 0x261   :  { %v346_v35 = vpop.permute.xlu1 %345 }
 0x262   :  { %v348_v36 = vmul.f32 %v346_v35, %v312_v17 }
 0x264   :  { %356 = vrot.lane.b32.xlu1 %v348_v36, %s2639_s0 }
 0x2c2   :  { %v351_v38 = vpop.permute.xlu0 %350 }
 0x2c3   :  { %354 = vst.msk [vmem:[#allocation3] sm:$0xff] %vm353_vm1, %v351_v38 }
 0x2d6   :  { %v357_v39 = vpop.permute.xlu1 %356 }
 0x2d7   :  { %360 = vst.msk [vmem:[#allocation3 + $0x38] sm:$0xff] %vm359_vm2, %v357_v39  ;;  %v361_v40 = vsel %vm353_vm1, %v351_v38, %v357_v39 }
 0x2d8   :  { %v364_v42 = vpack.c.bf16 %v361_v40, %v361_v40 }
 0x2da   :  { %2214 = vmatmul.mubr.msk.bf16.vlgmr.msra.gmra.mxu1 %vm258_vm3, %v364_v42 }
 0x2db   :  { %585 = vmatpush1.bf16.msra.mxu1 %v2740_v4  ;;  %608 = vmatprep.mubr.bf16.mxu1 %v2637_v1 }
 0x2dc   :  { %586 = vmatprep.subr.bf16.mxu1 %v2750_v6 }
 0x2df   :  { %587 = vmatpush1.bf16.msra.mxu1 %v2755_v7 }
 0x2e0   :  { %588 = vmatprep.subr.bf16.mxu1 %v2760_v8 }
 0x2e3   :  { %589 = vmatpush1.bf16.msra.mxu1 %v2769_v9 }
 0x2e4   :  { %590 = vmatprep.subr.bf16.mxu1 %v2776_v10 }
 0x2e7   :  { %591 = vmatpush1.bf16.msra.mxu1 %v2787_v12 }
 0x2e8   :  { %792 = vmatprep.subr.bf16.mxu1 %v2732_v2 }
 0x39a   :  { %v402_v43 = vpop.f32.mrf.mxu1 }
 0x39b   :  { %v409_v45 = vadd.f32 %v402_v43, %v2824_v27 }
 0x39c   :  { %v404_v46 = vpop.f32.mrf.mxu1 }
 0x39d   :  { %2499 = vtanh.f32 %v409_v45  ;;  %v410_v48 = vadd.f32 %v404_v46, %v2846_v55  ;;  %v411_v57 = vmul.f32 0.5, %v409_v45 }
 0x39e   :  { %v406_v50 = vpop.f32.mrf.mxu1 }
 0x39f   :  { %2501 = vtanh.f32 %v410_v48  ;;  %v412_v59 = vmul.f32 0.5, %v410_v48 }
 0x3a0   :  { %v407_v52 = vpop.f32.mrf.mxu1  ;;  %2503 = vtanh.f32 %v411_v57 }
 0x3a1   :  { %2505 = vtanh.f32 %v412_v59 }
 0x3aa   :  { %v2500_v54 = vpop.eup %2499 }
 0x3ab   :  { %423 = vrot.lane.b32.xlu0 %v2500_v54, %s2639_s0 }
 0x3ac   :  { %v2502_v56 = vpop.eup %2501 }
 0x3ad   :  { %440 = vrot.lane.b32.xlu1 %v2502_v56, %s2639_s0  ;;  %v2504_v60 = vpop.eup %2503 }
 0x3ae   :  { %v2506_v61 = vpop.eup %2505  ;;  %v415_v27 = vmul.f32 0.5, %v2504_v60 }
 0x3af   :  { %v416_v62 = vmul.f32 0.5, %v2506_v61 }
 0x3b0   :  { %v417_v63 = vadd.f32 0.5, %v415_v27 }
 0x3b1   :  { %v418_v3 = vadd.f32 0.5, %v416_v62 }
 0x3b2   :  { %v421_v13 = vmul.f32 %v417_v63, %v2854_v22 }
 0x3b3   :  { %v438_v16 = vmul.f32 %v418_v3, %v342_v28 }
 0x41d   :  { %v424_v0 = vpop.permute.xlu0 %423 }
 0x41e   :  { %v426_v55 = vmul.f32 %v424_v0, %v417_v63 }
 0x41f   :  { %v441_v5 = vpop.permute.xlu1 %440 }
 0x420   :  { %428 = vrot.lane.b32.xlu0 %v426_v55, %s2640_s2  ;;  %v443_v11 = vmul.f32 %v441_v5, %v418_v3 }
 0x422   :  { %445 = vrot.lane.b32.xlu1 %v443_v11, %s2640_s2 }
 0x492   :  { %v429_v14 = vpop.permute.xlu0 %428 }
 0x493   :  { %v431_v15 = vadd.f32 %v429_v14, %v421_v13 }
 0x494   :  { %v446_v17 = vpop.permute.xlu1 %445 }
 0x495   :  { %2507 = vtanh.f32 %v431_v15  ;;  %v448_v18 = vadd.f32 %v446_v17, %v438_v16 }
 0x497   :  { %2509 = vtanh.f32 %v448_v18 }
 0x4a2   :  { %v2508_v19 = vpop.eup %2507 }
 0x4a3   :  { %434 = vrot.lane.b32.xlu0 %v2508_v19, %s2639_s0 }
 0x4a4   :  { %v2510_v20 = vpop.eup %2509 }
 0x4a5   :  { %451 = vrot.lane.b32.xlu1 %v2510_v20, %s2639_s0 }
 0x515   :  { %v435_v21 = vpop.permute.xlu0 %434 }
 0x516   :  { %v437_v23 = vmul.f32 %v435_v21, %v417_v63 }
 0x517   :  { %v452_v24 = vpop.permute.xlu1 %451 }
 0x518   :  { %456 = vrot.lane.b32.xlu0 %v437_v23, %s2640_s2  ;;  %v454_v26 = vmul.f32 %v452_v24, %v418_v3 }
 0x51a   :  { %461 = vrot.lane.b32.xlu1 %v454_v26, %s2639_s0 }
 0x58a   :  { %v457_v22 = vpop.permute.xlu0 %456 }
 0x58b   :  { %459 = vst.msk [vmem:[#allocation3 + $0x8] sm:$0xff] %vm353_vm1, %v457_v22 }
 0x58c   :  { %v462_v28 = vpop.permute.xlu1 %461 }
 0x58d   :  { %464 = vst.msk [vmem:[#allocation3 + $0x30] sm:$0xff] %vm359_vm2, %v462_v28  ;;  %v465_v30 = vsel %vm353_vm1, %v457_v22, %v462_v28 }
 0x58e   :  { %v468_v32 = vpack.c.bf16 %v465_v30, %v465_v30 }
 0x590   :  { %2215 = vmatmul.mubr.msk.bf16.vlgmr.msra.gmra.mxu0 %vm258_vm3, %v468_v32 }
 0x591   :  { %689 = vmatpush1.bf16.msra.mxu0 %v2740_v4  ;;  %712 = vmatprep.mubr.bf16.mxu0 %v2637_v1 }
 0x592   :  { %690 = vmatprep.subr.bf16.mxu0 %v2750_v6 }
 0x595   :  { %691 = vmatpush1.bf16.msra.mxu0 %v2755_v7 }
 0x596   :  { %692 = vmatprep.subr.bf16.mxu0 %v2760_v8 }
 0x599   :  { %693 = vmatpush1.bf16.msra.mxu0 %v2769_v9 }
 0x59a   :  { %694 = vmatprep.subr.bf16.mxu0 %v2776_v10 }
 0x59d   :  { %695 = vmatpush1.bf16.msra.mxu0 %v2787_v12 }
 0x59e   :  { %896 = vmatprep.subr.bf16.mxu0 %v2732_v2 }
 0x650   :  { %v506_v33 = vpop.f32.mrf.mxu0 }
 0x651   :  { %v513_v35 = vadd.f32 %v506_v33, %v2828_v31 }
 0x652   :  { %v508_v36 = vpop.f32.mrf.mxu0 }
 0x653   :  { %2511 = vtanh.f32 %v513_v35  ;;  %v514_v38 = vadd.f32 %v508_v36, %v2842_v51  ;;  %v515_v45 = vmul.f32 0.5, %v513_v35 }
 0x654   :  { %v510_v39 = vpop.f32.mrf.mxu0 }
 0x655   :  { %2513 = vtanh.f32 %v514_v38  ;;  %v516_v46 = vmul.f32 0.5, %v514_v38 }
 0x656   :  { %v511_v40 = vpop.f32.mrf.mxu0  ;;  %2515 = vtanh.f32 %v515_v45 }
 0x657   :  { %2517 = vtanh.f32 %v516_v46 }
 0x660   :  { %v2512_v42 = vpop.eup %2511 }
 0x661   :  { %527 = vrot.lane.b32.xlu0 %v2512_v42, %s2639_s0 }
 0x662   :  { %v2514_v43 = vpop.eup %2513 }
 0x663   :  { %544 = vrot.lane.b32.xlu1 %v2514_v43, %s2639_s0  ;;  %v2516_v48 = vpop.eup %2515 }
 0x664   :  { %v2518_v50 = vpop.eup %2517  ;;  %v519_v31 = vmul.f32 0.5, %v2516_v48 }
 0x665   :  { %v520_v52 = vmul.f32 0.5, %v2518_v50 }
 0x666   :  { %v521_v54 = vadd.f32 0.5, %v519_v31 }
 0x667   :  { %v522_v57 = vadd.f32 0.5, %v520_v52 }
 0x668   :  { %v525_v61 = vmul.f32 %v521_v54, %v431_v15 }
 0x669   :  { %v542_v63 = vmul.f32 %v522_v57, %v448_v18 }
 0x6d3   :  { %v528_v56 = vpop.permute.xlu0 %527 }
 0x6d4   :  { %v530_v51 = vmul.f32 %v528_v56, %v521_v54 }
 0x6d5   :  { %v545_v59 = vpop.permute.xlu1 %544 }
 0x6d6   :  { %532 = vrot.lane.b32.xlu0 %v530_v51, %s2640_s2  ;;  %v547_v60 = vmul.f32 %v545_v59, %v522_v57 }
 0x6d8   :  { %549 = vrot.lane.b32.xlu1 %v547_v60, %s2640_s2 }
 0x748   :  { %v533_v27 = vpop.permute.xlu0 %532 }
 0x749   :  { %v535_v62 = vadd.f32 %v533_v27, %v525_v61 }
 0x74a   :  { %v550_v0 = vpop.permute.xlu1 %549 }
 0x74b   :  { %2519 = vtanh.f32 %v535_v62  ;;  %v552_v55 = vadd.f32 %v550_v0, %v542_v63 }
 0x74d   :  { %2521 = vtanh.f32 %v552_v55 }
 0x758   :  { %v2520_v3 = vpop.eup %2519 }
 0x759   :  { %538 = vrot.lane.b32.xlu0 %v2520_v3, %s2639_s0 }
 0x75a   :  { %v2522_v5 = vpop.eup %2521 }
 0x75b   :  { %555 = vrot.lane.b32.xlu1 %v2522_v5, %s2639_s0 }
 0x7cb   :  { %v539_v11 = vpop.permute.xlu0 %538 }
 0x7cc   :  { %v541_v13 = vmul.f32 %v539_v11, %v521_v54 }
 0x7cd   :  { %v556_v14 = vpop.permute.xlu1 %555 }
 0x7ce   :  { %560 = vrot.lane.b32.xlu0 %v541_v13, %s2640_s2  ;;  %v558_v16 = vmul.f32 %v556_v14, %v522_v57 }
 0x7d0   :  { %565 = vrot.lane.b32.xlu1 %v558_v16, %s2639_s0 }
 0x840   :  { %v561_v15 = vpop.permute.xlu0 %560 }
 0x841   :  { %563 = vst.msk [vmem:[#allocation3 + $0x10] sm:$0xff] %vm353_vm1, %v561_v15 }
 0x842   :  { %v566_v17 = vpop.permute.xlu1 %565 }
 0x843   :  { %568 = vst.msk [vmem:[#allocation3 + $0x28] sm:$0xff] %vm359_vm2, %v566_v17  ;;  %v569_v18 = vsel %vm353_vm1, %v561_v15, %v566_v17 }
 0x844   :  { %v572_v19 = vpack.c.bf16 %v569_v18, %v569_v18 }
 0x846   :  { %2216 = vmatmul.mubr.msk.bf16.vlgmr.msra.gmra.mxu1 %vm258_vm3, %v572_v19 }
 0x847   :  { %793 = vmatpush1.bf16.msra.mxu1 %v2740_v4  ;;  %816 = vmatprep.mubr.bf16.mxu1 %v2637_v1 }
 0x848   :  { %794 = vmatprep.subr.bf16.mxu1 %v2750_v6 }
 0x84b   :  { %795 = vmatpush1.bf16.msra.mxu1 %v2755_v7 }
 0x84c   :  { %796 = vmatprep.subr.bf16.mxu1 %v2760_v8 }
 0x84f   :  { %797 = vmatpush1.bf16.msra.mxu1 %v2769_v9 }
 0x850   :  { %798 = vmatprep.subr.bf16.mxu1 %v2776_v10 }
 0x853   :  { %799 = vmatpush1.bf16.msra.mxu1 %v2787_v12 }
 0x854   :  { %1000 = vmatprep.subr.bf16.mxu1 %v2732_v2 }
 0x906   :  { %v610_v20 = vpop.f32.mrf.mxu1 }
 0x907   :  { %v617_v21 = vadd.f32 %v610_v20, %v2832_v37 }
 0x908   :  { %v612_v23 = vpop.f32.mrf.mxu1 }
 0x909   :  { %2523 = vtanh.f32 %v617_v21  ;;  %v618_v24 = vadd.f32 %v612_v23, %v2838_v47  ;;  %v619_v32 = vmul.f32 0.5, %v617_v21 }
 0x90a   :  { %v614_v26 = vpop.f32.mrf.mxu1 }
 0x90b   :  { %2525 = vtanh.f32 %v618_v24  ;;  %v620_v33 = vmul.f32 0.5, %v618_v24 }
 0x90c   :  { %v615_v22 = vpop.f32.mrf.mxu1  ;;  %2527 = vtanh.f32 %v619_v32 }
 0x90d   :  { %2529 = vtanh.f32 %v620_v33 }
 0x916   :  { %v2524_v28 = vpop.eup %2523 }
 0x917   :  { %631 = vrot.lane.b32.xlu0 %v2524_v28, %s2639_s0 }
 0x918   :  { %v2526_v30 = vpop.eup %2525 }
 0x919   :  { %648 = vrot.lane.b32.xlu1 %v2526_v30, %s2639_s0  ;;  %v2528_v2 = vpop.eup %2527 }
 0x91a   :  { %v2530_v35 = vpop.eup %2529  ;;  %v623_v37 = vmul.f32 0.5, %v2528_v2 }
 0x91b   :  { %v624_v36 = vmul.f32 0.5, %v2530_v35 }
 0x91c   :  { %v625_v38 = vadd.f32 0.5, %v623_v37 }
 0x91d   :  { %v626_v40 = vadd.f32 0.5, %v624_v36 }
 0x91e   :  { %v629_v45 = vmul.f32 %v625_v38, %v535_v62 }
 0x91f   :  { %v646_v50 = vmul.f32 %v626_v40, %v552_v55 }
 0x989   :  { %v632_v39 = vpop.permute.xlu0 %631 }
 0x98a   :  { %v634_v47 = vmul.f32 %v632_v39, %v625_v38 }
 0x98b   :  { %v649_v42 = vpop.permute.xlu1 %648 }
 0x98c   :  { %636 = vrot.lane.b32.xlu0 %v634_v47, %s2640_s2  ;;  %v651_v43 = vmul.f32 %v649_v42, %v626_v40 }
 0x98e   :  { %653 = vrot.lane.b32.xlu1 %v651_v43, %s2640_s2 }
 0x9fe   :  { %v637_v46 = vpop.permute.xlu0 %636 }
 0x9ff   :  { %v639_v48 = vadd.f32 %v637_v46, %v629_v45 }
 0xa00   :  { %v654_v31 = vpop.permute.xlu1 %653 }
 0xa01   :  { %2531 = vtanh.f32 %v639_v48  ;;  %v656_v52 = vadd.f32 %v654_v31, %v646_v50 }
 0xa03   :  { %2533 = vtanh.f32 %v656_v52 }
 0xa0e   :  { %v2532_v54 = vpop.eup %2531 }
 0xa0f   :  { %642 = vrot.lane.b32.xlu0 %v2532_v54, %s2639_s0 }
 0xa10   :  { %v2534_v56 = vpop.eup %2533 }
 0xa11   :  { %659 = vrot.lane.b32.xlu1 %v2534_v56, %s2639_s0 }
 0xa81   :  { %v643_v51 = vpop.permute.xlu0 %642 }
 0xa82   :  { %v645_v57 = vmul.f32 %v643_v51, %v625_v38 }
 0xa83   :  { %v660_v59 = vpop.permute.xlu1 %659 }
 0xa84   :  { %664 = vrot.lane.b32.xlu0 %v645_v57, %s2640_s2  ;;  %v662_v60 = vmul.f32 %v660_v59, %v626_v40 }
 0xa86   :  { %669 = vrot.lane.b32.xlu1 %v662_v60, %s2639_s0 }
 0xaf6   :  { %v665_v61 = vpop.permute.xlu0 %664 }
 0xaf7   :  { %667 = vst.msk [vmem:[#allocation3 + $0x18] sm:$0xff] %vm353_vm1, %v665_v61 }
 0xaf8   :  { %v670_v27 = vpop.permute.xlu1 %669 }
 0xaf9   :  { %672 = vst.msk [vmem:[#allocation3 + $0x20] sm:$0xff] %vm359_vm2, %v670_v27  ;;  %v673_v62 = vsel %vm353_vm1, %v665_v61, %v670_v27 }
 0xafa   :  { %v676_v63 = vpack.c.bf16 %v673_v62, %v673_v62 }
 0xafc   :  { %2217 = vmatmul.mubr.msk.bf16.vlgmr.msra.gmra.mxu0 %vm258_vm3, %v676_v63 }
 0xafd   :  { %897 = vmatpush1.bf16.msra.mxu0 %v2740_v4  ;;  %920 = vmatprep.mubr.bf16.mxu0 %v2637_v1 }
 0xafe   :  { %898 = vmatprep.subr.bf16.mxu0 %v2750_v6 }
 0xb01   :  { %899 = vmatpush1.bf16.msra.mxu0 %v2755_v7 }
 0xb02   :  { %900 = vmatprep.subr.bf16.mxu0 %v2760_v8 }
 0xb05   :  { %901 = vmatpush1.bf16.msra.mxu0 %v2769_v9 }
 0xb06   :  { %902 = vmatprep.subr.bf16.mxu0 %v2776_v10 }
 0xb09   :  { %903 = vmatpush1.bf16.msra.mxu0 %v2787_v12 }
 0xbbc   :  { %v714_v0 = vpop.f32.mrf.mxu0 }
 0xbbd   :  { %v721_v55 = vadd.f32 %v714_v0, %v2836_v44 }
 0xbbe   :  { %v716_v3 = vpop.f32.mrf.mxu0 }
 0xbbf   :  { %2535 = vtanh.f32 %v721_v55  ;;  %v722_v5 = vadd.f32 %v716_v3, %v2834_v41  ;;  %v723_v15 = vmul.f32 0.5, %v721_v55 }
 0xbc0   :  { %v718_v11 = vpop.f32.mrf.mxu0 }
 0xbc1   :  { %2537 = vtanh.f32 %v722_v5  ;;  %v724_v17 = vmul.f32 0.5, %v722_v5 }
 0xbc2   :  { %v719_v13 = vpop.f32.mrf.mxu0  ;;  %2539 = vtanh.f32 %v723_v15 }
 0xbc3   :  { %2541 = vtanh.f32 %v724_v17 }
 0xbcc   :  { %v2536_v14 = vpop.eup %2535 }
 0xbcd   :  { %735 = vrot.lane.b32.xlu0 %v2536_v14, %s2639_s0 }
 0xbce   :  { %v2538_v16 = vpop.eup %2537 }
 0xbcf   :  { %752 = vrot.lane.b32.xlu1 %v2538_v16, %s2639_s0  ;;  %v2540_v18 = vpop.eup %2539 }
 0xbd0   :  { %v2542_v19 = vpop.eup %2541  ;;  %v727_v44 = vmul.f32 0.5, %v2540_v18 }
 0xbd1   :  { %v728_v20 = vmul.f32 0.5, %v2542_v19 }
 0xbd2   :  { %v729_v21 = vadd.f32 0.5, %v727_v44 }
 0xbd3   :  { %v730_v24 = vadd.f32 0.5, %v728_v20 }
 0xbd4   :  { %v733_v28 = vmul.f32 %v729_v21, %v639_v48 }
 0xbd5   :  { %v750_v33 = vmul.f32 %v730_v24, %v656_v52 }
 0xc3f   :  { %v736_v23 = vpop.permute.xlu0 %735 }
 0xc40   :  { %v738_v41 = vmul.f32 %v736_v23, %v729_v21 }
 0xc41   :  { %v753_v26 = vpop.permute.xlu1 %752 }
 0xc42   :  { %740 = vrot.lane.b32.xlu0 %v738_v41, %s2640_s2  ;;  %v755_v22 = vmul.f32 %v753_v26, %v730_v24 }
 0xc44   :  { %757 = vrot.lane.b32.xlu1 %v755_v22, %s2640_s2 }
 0xcb4   :  { %v741_v30 = vpop.permute.xlu0 %740 }
 0xcb5   :  { %v743_v32 = vadd.f32 %v741_v30, %v733_v28 }
 0xcb6   :  { %v758_v2 = vpop.permute.xlu1 %757 }
 0xcb7   :  { %2543 = vtanh.f32 %v743_v32  ;;  %v760_v35 = vadd.f32 %v758_v2, %v750_v33 }
 0xcb9   :  { %2545 = vtanh.f32 %v760_v35 }
 0xcc4   :  { %v2544_v37 = vpop.eup %2543 }
 0xcc5   :  { %746 = vrot.lane.b32.xlu0 %v2544_v37, %s2639_s0 }
 0xcc6   :  { %v2546_v36 = vpop.eup %2545 }
 0xcc7   :  { %763 = vrot.lane.b32.xlu1 %v2546_v36, %s2639_s0 }
 0xd37   :  { %v747_v38 = vpop.permute.xlu0 %746 }
 0xd38   :  { %v749_v39 = vmul.f32 %v747_v38, %v729_v21 }
 0xd39   :  { %v764_v47 = vpop.permute.xlu1 %763 }
 0xd3a   :  { %768 = vrot.lane.b32.xlu0 %v749_v39, %s2640_s2  ;;  %v766_v40 = vmul.f32 %v764_v47, %v730_v24 }
 0xd3c   :  { %773 = vrot.lane.b32.xlu1 %v766_v40, %s2639_s0 }
 0xdac   :  { %v769_v42 = vpop.permute.xlu0 %768 }
 0xdad   :  { %771 = vst.msk [vmem:[#allocation3 + $0x20] sm:$0xff] %vm353_vm1, %v769_v42 }
 0xdae   :  { %v774_v43 = vpop.permute.xlu1 %773 }
 0xdaf   :  { %776 = vst.msk [vmem:[#allocation3 + $0x18] sm:$0xff] %vm359_vm2, %v774_v43  ;;  %v777_v45 = vsel %vm353_vm1, %v769_v42, %v774_v43 }
 0xdb0   :  { %v780_v46 = vpack.c.bf16 %v777_v45, %v777_v45 }
 0xdb2   :  { %2218 = vmatmul.mubr.msk.bf16.vlgmr.msra.gmra.mxu1 %vm258_vm3, %v780_v46 }
 0xdb3   :  { %1001 = vmatpush1.bf16.msra.mxu1 %v2740_v4  ;;  %1024 = vmatprep.mubr.bf16.mxu1 %v2637_v1 }
 0xdb4   :  { %1002 = vmatprep.subr.bf16.mxu1 %v2750_v6 }
 0xdb7   :  { %1003 = vmatpush1.bf16.msra.mxu1 %v2755_v7 }
 0xdb8   :  { %1004 = vmatprep.subr.bf16.mxu1 %v2760_v8 }
 0xdbb   :  { %1005 = vmatpush1.bf16.msra.mxu1 %v2769_v9 }
 0xdbc   :  { %1006 = vmatprep.subr.bf16.mxu1 %v2776_v10 }
 0xdbf   :  { %1007 = vmatpush1.bf16.msra.mxu1 %v2787_v12 }
 0xe72   :  { %v818_v48 = vpop.f32.mrf.mxu1 }
 0xe73   :  { %v825_v50 = vadd.f32 %v818_v48, %v2840_v49 }
 0xe74   :  { %v820_v31 = vpop.f32.mrf.mxu1 }
 0xe75   :  { %2547 = vtanh.f32 %v825_v50  ;;  %v826_v4 = vadd.f32 %v820_v31, %v2830_v34  ;;  %v827_v8 = vmul.f32 0.5, %v825_v50 }
 0xe76   :  { %v822_v52 = vpop.f32.mrf.mxu1 }
 0xe77   :  { %2549 = vtanh.f32 %v826_v4  ;;  %v828_v9 = vmul.f32 0.5, %v826_v4 }
 0xe78   :  { %v823_v6 = vpop.f32.mrf.mxu1  ;;  %2551 = vtanh.f32 %v827_v8 }
 0xe79   :  { %2553 = vtanh.f32 %v828_v9 }
 0xe82   :  { %v2548_v54 = vpop.eup %2547 }
 0xe83   :  { %839 = vrot.lane.b32.xlu0 %v2548_v54, %s2639_s0 }
 0xe84   :  { %v2550_v7 = vpop.eup %2549 }
 0xe85   :  { %856 = vrot.lane.b32.xlu1 %v2550_v7, %s2639_s0  ;;  %v2552_v10 = vpop.eup %2551 }
 0xe86   :  { %v2554_v12 = vpop.eup %2553  ;;  %v831_v49 = vmul.f32 0.5, %v2552_v10 }
 0xe87   :  { %v832_v56 = vmul.f32 0.5, %v2554_v12 }
 0xe88   :  { %v833_v51 = vadd.f32 0.5, %v831_v49 }
 0xe89   :  { %v834_v59 = vadd.f32 0.5, %v832_v56 }
 0xe8a   :  { %v837_v27 = vmul.f32 %v833_v51, %v743_v32 }
 0xe8b   :  { %v854_v0 = vmul.f32 %v834_v59, %v760_v35 }
 0xef5   :  { %v840_v57 = vpop.permute.xlu0 %839 }
 0xef6   :  { %v842_v34 = vmul.f32 %v840_v57, %v833_v51 }
 0xef7   :  { %v857_v60 = vpop.permute.xlu1 %856 }
 0xef8   :  { %844 = vrot.lane.b32.xlu0 %v842_v34, %s2640_s2  ;;  %v859_v61 = vmul.f32 %v857_v60, %v834_v59 }
 0xefa   :  { %861 = vrot.lane.b32.xlu1 %v859_v61, %s2640_s2 }
 0xf6a   :  { %v845_v62 = vpop.permute.xlu0 %844 }
 0xf6b   :  { %v847_v63 = vadd.f32 %v845_v62, %v837_v27 }
 0xf6c   :  { %v862_v55 = vpop.permute.xlu1 %861 }
 0xf6d   :  { %2555 = vtanh.f32 %v847_v63  ;;  %v864_v3 = vadd.f32 %v862_v55, %v854_v0 }
 0xf6f   :  { %2557 = vtanh.f32 %v864_v3 }
 0xf7a   :  { %v2556_v5 = vpop.eup %2555 }
 0xf7b   :  { %850 = vrot.lane.b32.xlu0 %v2556_v5, %s2639_s0  ;;  %v2467_v5 = vld [vmem:[%s3252_s7 + $0x18] sm:$0xff]  }
 0xf7c   :  { %v2558_v11 = vpop.eup %2557 }
 0xf7d   :  { %867 = vrot.lane.b32.xlu1 %v2558_v11, %s2639_s0  ;;  %v2468_v11 = vld [vmem:[%s3252_s7 + $0x10] sm:$0xff]  }
 0xfed   :  { %v851_v13 = vpop.permute.xlu0 %850 }
 0xfee   :  { %v853_v14 = vmul.f32 %v851_v13, %v833_v51 }
 0xfef   :  { %v868_v16 = vpop.permute.xlu1 %867 }
 0xff0   :  { %872 = vrot.lane.b32.xlu0 %v853_v14, %s2640_s2  ;;  %v870_v15 = vmul.f32 %v868_v16, %v834_v59 }
 0xff2   :  { %877 = vrot.lane.b32.xlu1 %v870_v15, %s2639_s0  ;;  %v2469_v15 = vld [vmem:[%s3252_s7 + $0x8] sm:$0xff]  }
0x1062   :  { %v873_v17 = vpop.permute.xlu0 %872 }
0x1063   :  { %875 = vst.msk [vmem:[#allocation3 + $0x28] sm:$0xff] %vm353_vm1, %v873_v17 }
0x1064   :  { %v878_v18 = vpop.permute.xlu1 %877 }
0x1065   :  { %880 = vst.msk [vmem:[#allocation3 + $0x10] sm:$0xff] %vm359_vm2, %v878_v18  ;;  %v881_v19 = vsel %vm353_vm1, %v873_v17, %v878_v18  ;;  %v2470_v18 = vld [vmem:[%s3252_s7] sm:$0xff]  }
0x1066   :  { %v884_v44 = vpack.c.bf16 %v881_v19, %v881_v19 }
0x1068   :  { %2219 = vmatmul.mubr.msk.bf16.vlgmr.msra.gmra.mxu0 %vm258_vm3, %v884_v44 }
0x1128   :  { %v922_v20 = vpop.f32.mrf.mxu0 }
0x1129   :  { %v929_v21 = vadd.f32 %v922_v20, %v2844_v53 }
0x112a   :  { %v924_v23 = vpop.f32.mrf.mxu0 }
0x112b   :  { %2559 = vtanh.f32 %v929_v21  ;;  %v930_v41 = vadd.f32 %v924_v23, %v2826_v29  ;;  %v931_v30 = vmul.f32 0.5, %v929_v21 }
0x112c   :  { %v926_v24 = vpop.f32.mrf.mxu0 }
0x112d   :  { %2561 = vtanh.f32 %v930_v41  ;;  %v932_v32 = vmul.f32 0.5, %v930_v41 }
0x112e   :  { %v927_v26 = vpop.f32.mrf.mxu0  ;;  %2563 = vtanh.f32 %v931_v30 }
0x112f   :  { %2565 = vtanh.f32 %v932_v32 }
0x1138   :  { %v2560_v22 = vpop.eup %2559 }
0x1139   :  { %943 = vrot.lane.b32.xlu0 %v2560_v22, %s2639_s0 }
0x113a   :  { %v2562_v28 = vpop.eup %2561 }
0x113b   :  { %960 = vrot.lane.b32.xlu1 %v2562_v28, %s2639_s0  ;;  %v2564_v33 = vpop.eup %2563 }
0x113c   :  { %v2566_v2 = vpop.eup %2565  ;;  %v935_v53 = vmul.f32 0.5, %v2564_v33 }
0x113d   :  { %v936_v35 = vmul.f32 0.5, %v2566_v2  ;;  %v2471_v2 = vld [vmem:[%s3253_s4 + $0x18] sm:$0xff]  }
0x113e   :  { %v937_v37 = vadd.f32 0.5, %v935_v53  ;;  %v2472_v53 = vld [vmem:[%s3253_s4 + $0x10] sm:$0xff]  }
0x113f   :  { %v938_v38 = vadd.f32 0.5, %v936_v35  ;;  %v2473_v35 = vld [vmem:[%s3253_s4 + $0x8] sm:$0xff]  }
0x1140   :  { %v941_v40 = vmul.f32 %v937_v37, %v847_v63 }
0x1141   :  { %v958_v45 = vmul.f32 %v938_v38, %v864_v3 }
0x11ab   :  { %v944_v36 = vpop.permute.xlu0 %943 }
0x11ac   :  { %v946_v29 = vmul.f32 %v944_v36, %v937_v37 }
0x11ad   :  { %v961_v39 = vpop.permute.xlu1 %960 }
0x11ae   :  { %948 = vrot.lane.b32.xlu0 %v946_v29, %s2640_s2  ;;  %v963_v47 = vmul.f32 %v961_v39, %v938_v38 }
0x11b0   :  { %965 = vrot.lane.b32.xlu1 %v963_v47, %s2640_s2 }
0x1220   :  { %v949_v42 = vpop.permute.xlu0 %948 }
0x1221   :  { %v951_v43 = vadd.f32 %v949_v42, %v941_v40 }
0x1222   :  { %v966_v46 = vpop.permute.xlu1 %965 }
0x1223   :  { %2567 = vtanh.f32 %v951_v43  ;;  %v2985_v48 = vadd.f32 %v966_v46, %v958_v45 }
0x1225   :  { %2569 = vtanh.f32 %v2985_v48 }
0x1230   :  { %v2568_v50 = vpop.eup %2567 }
0x1231   :  { %954 = vrot.lane.b32.xlu0 %v2568_v50, %s2639_s0 }
0x1232   :  { %v2570_v31 = vpop.eup %2569 }
0x1233   :  { %971 = vrot.lane.b32.xlu1 %v2570_v31, %s2639_s0 }
0x12a3   :  { %v955_v4 = vpop.permute.xlu0 %954 }
0x12a4   :  { %v957_v52 = vmul.f32 %v955_v4, %v937_v37  ;;  %v2474_v37 = vld [vmem:[%s3253_s4] sm:$0xff]   ;;  %v1257_v4 = vld [vmem:[#allocation3 + $0x28] sm:$0xff] }
0x12a5   :  { %v972_v6 = vpop.permute.xlu1 %971 }
0x12a6   :  { %976 = vrot.lane.b32.xlu0 %v957_v52, %s2640_s2  ;;  %v974_v54 = vmul.f32 %v972_v6, %v938_v38  ;;  %v2221_v38 = vld [vmem:[%s3254_s8] ss:$0 sm:$0xff]  ;;  %v1255_v6 = vld [vmem:[#allocation3 + $0x18] sm:$0xff] }
0x12a8   :  { %981 = vrot.lane.b32.xlu1 %v974_v54, %s2639_s0 }
0x1318   :  { %v977_v7 = vpop.permute.xlu0 %976 }
0x1319   :  { %979 = vst.msk [vmem:[#allocation3 + $0x30] sm:$0xff] %vm353_vm1, %v977_v7 }
0x131a   :  { %v982_v8 = vpop.permute.xlu1 %981 }
0x131b   :  { %984 = vst.msk [vmem:[#allocation3 + $0x8] sm:$0xff] %vm359_vm2, %v982_v8  ;;  %v985_v9 = vsel %vm353_vm1, %v977_v7, %v982_v8  ;;  %v1256_v7 = vld [vmem:[#allocation3 + $0x20] sm:$0xff] }
0x131c   :  { %v988_v10 = vpack.c.bf16 %v985_v9, %v985_v9  ;;  %v1269_v8 = vpack.c.bf16 %v1257_v4, %v1256_v7 }
0x131e   :  { %2220 = vmatmul.mubr.msk.bf16.vlgmr.msra.gmra.mxu1 %vm258_vm3, %v988_v10 }
0x1320   :  { %v1258_v9 = vld [vmem:[#allocation3 + $0x30] sm:$0xff] }
0x1322   :  { %v1253_v31 = vld [vmem:[#allocation3 + $0x8] sm:$0xff] }
0x13de   :  { %v1026_v12 = vpop.f32.mrf.mxu1 }
0x13df   :  { %v1033_v49 = vadd.f32 %v1026_v12, %v2848_v58 }
0x13e0   :  { %v1028_v56 = vpop.f32.mrf.mxu1 }
0x13e1   :  { %2571 = vtanh.f32 %v1033_v49  ;;  %v1034_v51 = vadd.f32 %v1028_v56, %v2822_v25  ;;  %v1035_v60 = vmul.f32 0.5, %v1033_v49  ;;  %v2641_v25 = vmov 0.0  }
0x13e2   :  { %v1030_v57 = vpop.f32.mrf.mxu1  ;;  %2313 = vmatprep.subr.bf16.mxu0 %v2641_v25  ;;  %2325 = vmatprep.subr.bf16.mxu1 %v2641_v25 }
0x13e3   :  { %2573 = vtanh.f32 %v1035_v60  ;;  %2314 = vmatpush3.bf16.msra.mxu0 %v2467_v5  ;;  %v1036_v16 = vmul.f32 0.5, %v1034_v51  ;;  %2321 = vmatprep.mubr.msk.bf16.mxu0 %vm2642_vm4, %v2641_v25  ;;  %v2476_v60 = vld [vmem:[%s3255_s9 + $0x10] sm:$0xff]   ;;  %v3083_v5 = vld [vmem:[%s3257_s5] sm:$0xff]  }
0x13e4   :  { %v1031_v34 = vpop.f32.mrf.mxu1  ;;  %2315 = vmatprep.subr.bf16.mxu0 %v2641_v25  ;;  %2329 = vmatprep.mubr.msk.bf16.mxu1 %vm2642_vm4, %v2641_v25 }
0x13e7   :  { %2316 = vmatpush3.bf16.msra.mxu0 %v2468_v11 }
0x13e8   :  { %2317 = vmatprep.subr.bf16.mxu0 %v2641_v25 }
0x13eb   :  { %2318 = vmatpush3.bf16.msra.mxu0 %v2469_v15 }
0x13ec   :  { %2319 = vmatprep.subr.bf16.mxu0 %v2641_v25 }
0x13ee   :  { %v2572_v59 = vpop.eup %2571 }
0x13ef   :  { %1047 = vrot.lane.b32.xlu0 %v2572_v59, %s2639_s0  ;;  %2320 = vmatpush3.bf16.msra.mxu0 %v2470_v18  ;;  %v2475_v59 = vld [vmem:[%s3255_s9 + $0x18] sm:$0xff]  }
0x13f0   :  { %v2574_v61 = vpop.eup %2573  ;;  %2333 = vmatprep.subr.bf16.mxu0 %v2471_v2  ;;  %2326 = vmatpush3.bf16.msra.mxu1 %v2475_v59 }
0x13f1   :  { %v1039_v27 = vmul.f32 0.5, %v2574_v61  ;;  %2327 = vmatprep.subr.bf16.mxu1 %v2641_v25 }
0x13f3   :  { %v1041_v62 = vadd.f32 0.5, %v1039_v27  ;;  %v3065_v27 = vld [vmem:[%s3256_s6] ss:$0 sm:$0xff] }
0x13f4   :  { %2328 = vmatpush3.bf16.msra.mxu1 %v2476_v60 }
0x13f5   :  { %v1045_v55 = vmul.f32 %v1041_v62, %v951_v43  ;;  %2349 = vmatprep.subr.bf16.mxu1 %v2641_v25 }
0x1461   :  { %v1048_v63 = vpop.permute.xlu0 %1047 }
0x1462   :  { %v1050_v0 = vmul.f32 %v1048_v63, %v1041_v62 }
0x1464   :  { %1052 = vrot.lane.b32.xlu1 %v1050_v0, %s2640_s2  ;;  %v3073_v0 = vld [vmem:[%s3257_s5 + $0x8] sm:$0xff]  }
0x14d6   :  { %v1053_v58 = vpop.permute.xlu1 %1052 }
0x14d7   :  { %v1055_v3 = vadd.f32 %v1053_v58, %v1045_v55 }
0x14d9   :  { %2575 = vtanh.f32 %v1055_v3 }
0x14da   :  { %2577 = vtanh.f32 %v1034_v51 }
0x14db   :  { %2579 = vtanh.f32 %v1036_v16 }
0x14e6   :  { %v2576_v13 = vpop.eup %2575 }
0x14e7   :  { %1058 = vrot.lane.b32.xlu0 %v2576_v13, %s2639_s0  ;;  %v2578_v14 = vpop.eup %2577 }
0x14e8   :  { %v2580_v17 = vpop.eup %2579 }
0x14e9   :  { %v1040_v19 = vmul.f32 0.5, %v2580_v17 }
0x14eb   :  { %1064 = vrot.lane.b32.xlu0 %v2578_v14, %s2639_s0  ;;  %v1042_v21 = vadd.f32 0.5, %v1040_v19 }
0x14ed   :  { %v1062_v26 = vmul.f32 %v1042_v21, %v2985_v48  ;;  %v1254_v48 = vld [vmem:[#allocation3 + $0x10] sm:$0xff] }
0x14ee   :  { %v1268_v54 = vpack.c.bf16 %v1255_v6, %v1254_v48 }
0x1559   :  { %v1059_v44 = vpop.permute.xlu0 %1058 }
0x155a   :  { %v1061_v20 = vmul.f32 %v1059_v44, %v1041_v62 }
0x155c   :  { %1080 = vrot.lane.b32.xlu1 %v1061_v20, %s2640_s2 }
0x155d   :  { %v1065_v23 = vpop.permute.xlu0 %1064 }
0x155e   :  { %v1067_v41 = vmul.f32 %v1065_v23, %v1042_v21 }
0x1560   :  { %1069 = vrot.lane.b32.xlu1 %v1067_v41, %s2640_s2 }
0x15ce   :  { %v1081_v24 = vpop.permute.xlu1 %1080 }
0x15cf   :  { %1083 = vst.msk [vmem:[#allocation3 + $0x38] sm:$0xff] %vm353_vm1, %v1081_v24 }
0x15d2   :  { %v1070_v22 = vpop.permute.xlu1 %1069 }
0x15d3   :  { %v1072_v28 = vadd.f32 %v1070_v22, %v1062_v26 }
0x15d5   :  { %2581 = vtanh.f32 %v1072_v28 }
0x15d6   :  { %v1089_v30 = vld [vmem:[#allocation3 + $0x38] sm:$0xff] }
0x15d7   :  { %v1098_v32 = vpack.c.bf16 %v1089_v30, %v1089_v30  ;;  %v1270_v10 = vpack.c.bf16 %v1089_v30, %v1258_v9 }
0x15d9   :  { %2322 = vmatmul.mubr.msk.bf16.vlgmr.msra.gmra.mxu0 %vm258_vm3, %v1098_v32 }
0x15da   :  { %2334 = vmatpush3.bf16.msra.mxu0 %v2471_v2 }
0x15db   :  { %2335 = vmatprep.subr.bf16.mxu0 %v2472_v53 }
0x15de   :  { %2336 = vmatpush3.bf16.msra.mxu0 %v2472_v53 }
0x15df   :  { %2337 = vmatprep.subr.bf16.mxu0 %v2473_v35 }
0x15e2   :  { %v2582_v33 = vpop.eup %2581  ;;  %2338 = vmatpush3.bf16.msra.mxu0 %v2473_v35 }
0x15e3   :  { %1075 = vrot.lane.b32.xlu1 %v2582_v33, %s2639_s0  ;;  %2339 = vmatprep.subr.bf16.mxu0 %v2474_v37 }
0x15e6   :  { %2340 = vmatpush3.bf16.msra.mxu0 %v2474_v37 }
0x15e7   :  { %2373 = vmatprep.subr.bf16.mxu0 %v2641_v25 }
0x1655   :  { %v1076_v36 = vpop.permute.xlu1 %1075 }
0x1656   :  { %v1078_v29 = vmul.f32 %v1076_v36, %v1042_v21 }
0x1658   :  { %1085 = vrot.lane.b32.xlu1 %v1078_v29, %s2639_s0 }
0x1699   :  { %v1167_v39 = vpop.f32.mrf.mxu0 }
0x169a   :  { %v1168_v47 = vadd.f32 %v2221_v38, %v1167_v39 }
0x169b   :  { %v2323_v40 = vpop.f32.mrf.mxu0 }
0x169c   :  { %2583 = vtanh.f32 %v1168_v47  ;;  %v1173_v12 = vmul.f32 0.5, %v1168_v47 }
0x169d   :  { %v1170_v42 = vpop.f32.mrf.mxu0 }
0x169e   :  { %2585 = vtanh.f32 %v1173_v12 }
0x169f   :  { %v2324_v43 = vpop.f32.mrf.mxu0 }
0x16a9   :  { %v2584_v45 = vpop.eup %2583 }
0x16aa   :  { %1179 = vrot.lane.b32.xlu0 %v2584_v45, %s2639_s0 }
0x16ab   :  { %v2586_v49 = vpop.eup %2585 }
0x16ac   :  { %v1175_v56 = vmul.f32 0.5, %v2586_v49 }
0x16ae   :  { %v1176_v51 = vadd.f32 0.5, %v1175_v56 }
0x16ca   :  { %v1086_v46 = vpop.permute.xlu1 %1085 }
0x16cb   :  { %1088 = vst.msk [vmem:[#allocation3] sm:$0xff] %vm359_vm2, %v1086_v46 }
0x16d2   :  { %v1252_v50 = vld [vmem:[#allocation3] sm:$0xff] }
0x16d3   :  { %v1267_v52 = vpack.c.bf16 %v1253_v31, %v1252_v50 }
0x16d5   :  { %2341 = vmatprep.mubr.msk.bf16.mxu0 %vm258_vm3, %v1267_v52 }
0x16d6   :  { %2342 = vmatmul.mubr.msk.bf16.vlgmr.msra.gmra.mxu0 %vm258_vm3, %v1268_v54 }
0x16d7   :  { %2345 = vmatprep.mubr.msk.bf16.mxu0 %vm258_vm3, %v1269_v8  ;;  %2374 = vmatpush3.bf16.msra.mxu0 %v3073_v0 }
0x16d8   :  { %2375 = vmatprep.subr.bf16.mxu0 %v2641_v25 }
0x16db   :  { %2376 = vmatpush3.bf16.msra.mxu0 %v3083_v5 }
0x16dc   :  { %2389 = vmatprep.subr.bf16.mxu0 %v2641_v25 }
0x16de   :  { %2346 = vmatmul.mubr.msk.bf16.gmra.mxu0 %vm258_vm3, %v1270_v10 }
0x16df   :  { %2377 = vmatprep.mubr.msk.bf16.mxu0 %vm2642_vm4, %v2641_v25 }
0x171c   :  { %v1180_v57 = vpop.permute.xlu0 %1179 }
0x171d   :  { %v1182_v34 = vmul.f32 %v1180_v57, %v1176_v51 }
0x171f   :  { %2587 = vtanh.f32 %v1182_v34 }
0x172c   :  { %v2588_v61 = vpop.eup %2587 }
0x172d   :  { %1185 = vrot.lane.b32.xlu0 %v2588_v61, %s2643_s17 }
0x1796   :  { %v2343_v62 = vpop.f32.mrf.mxu0 }
0x1797   :  { %v3068_v63 = vadd.f32 %v2343_v62, %v3065_v27 }
0x1798   :  { %v1348_v55 = vpop.f32.mrf.mxu0 }
0x1799   :  { %v1349_v22 = vadd.f32 %v3065_v27, %v1348_v55 }
0x179a   :  { %v2344_v58 = vpop.f32.mrf.mxu0 }
0x179b   :  { %v3078_v3 = vadd.f32 %v2344_v58, %v3065_v27 }
0x179c   :  { %v3085_v11 = vpop.f32.mrf.mxu0 }
0x179d   :  { %v1352_v50 = vadd.f32 %v3065_v27, %v3085_v11 }
0x179e   :  { %v2347_v13 = vpop.f32.mrf.mxu0 }
0x179f   :  { %v3090_v14 = vadd.f32 %v2347_v13, %v3065_v27  ;;  %v1186_v16 = vpop.permute.xlu0 %1185 }
0x17a0   :  { %v1188_v15 = vmul.f32 %v1186_v16, %v1176_v51  ;;  %v1364_v17 = vpop.f32.mrf.mxu0 }
0x17a1   :  { %v3093_v18 = vadd.f32 %v3065_v27, %v1364_v17 }
0x17a2   :  { %v1193_v19 = vpack.c.bf16 %v1188_v15, %v1188_v15  ;;  %v2348_v44 = vpop.f32.mrf.mxu0 }
0x17a3   :  { %v3096_v20 = vadd.f32 %v2348_v44, %v3065_v27 }
0x17a4   :  { %1195 = vrot.lane.b32.xlu0 %v1193_v19, %s2640_s2 }
0x1816   :  { %v1196_v21 = vpop.permute.xlu0 %1195 }
0x1817   :  { %2330 = vmatmul.mubr.msk.bf16.vlgmr.msra.gmra.mxu1 %vm353_vm1, %v1196_v21 }
0x1818   :  { %2350 = vmatpush3.bf16.msra.mxu1 %v3073_v0  ;;  %2353 = vmatprep.mubr.msk.bf16.mxu1 %vm2642_vm4, %v2641_v25 }
0x1819   :  { %2351 = vmatprep.subr.bf16.mxu1 %v2641_v25 }
0x181c   :  { %2352 = vmatpush3.bf16.msra.mxu1 %v3083_v5 }
0x181d   :  { %2357 = vmatprep.subr.bf16.mxu1 %v2641_v25 }
0x181f   :  { %2354 = vmatmul.mubr.bf16.vlgmr.msra.gmra.mxu1 %v2637_v1 }
0x1820   :  { %2358 = vmatpush3.bf16.msra.mxu1 %v3073_v0  ;;  %2361 = vmatprep.mubr.msk.bf16.mxu1 %vm2642_vm4, %v2641_v25 }
0x1821   :  { %2359 = vmatprep.subr.bf16.mxu1 %v2641_v25 }
0x1824   :  { %2360 = vmatpush3.bf16.msra.mxu1 %v3083_v5 }
0x1825   :  { %2365 = vmatprep.subr.bf16.mxu1 %v2641_v25 }
0x18d7   :  { %v3113_v23 = vpop.f32.mrf.mxu1 }
0x18d9   :  { %v2331_v41 = vpop.f32.mrf.mxu1 }
0x18db   :  { %v1249_v24 = vpop.f32.mrf.mxu1 }
0x18dd   :  { %v2332_v26 = vpop.f32.mrf.mxu1 }
0x18df   :  { %v1441_v28 = vpop.f32.mrf.mxu1 }
0x18e0   :  { %v1447_v1 = vadd.f32 %v1441_v28, %v1349_v22 }
0x18e1   :  { %v2355_v30 = vpop.f32.mrf.mxu1 }
0x18e2   :  { %2589 = vtanh.f32 %v1447_v1  ;;  %v1448_v53 = vmul.f32 0.5, %v1447_v1 }
0x18e3   :  { %v1444_v32 = vpop.f32.mrf.mxu1 }
0x18e4   :  { %2591 = vtanh.f32 %v1448_v53  ;;  %v3152_v53 = vpop.f32.mrf.mxu0 }
0x18e5   :  { %v2356_v33 = vpop.f32.mrf.mxu1 }
0x18ef   :  { %v2590_v2 = vpop.eup %2589 }
0x18f0   :  { %1455 = vrot.lane.b32.xlu1 %v2590_v2, %s2639_s0 }
0x18f1   :  { %v2592_v35 = vpop.eup %2591 }
0x18f2   :  { %v1450_v37 = vmul.f32 0.5, %v2592_v35 }
0x18f4   :  { %v1451_v36 = vadd.f32 0.5, %v1450_v37 }
0x18f6   :  { %v1453_v39 = vmul.f32 0.0, %v1451_v36 }
0x1962   :  { %v1456_v29 = vpop.permute.xlu1 %1455 }
0x1963   :  { %v1458_v38 = vmul.f32 %v1456_v29, %v1451_v36 }
0x1965   :  { %1460 = vrot.lane.b32.xlu0 %v1458_v38, %s2640_s2 }
0x19d7   :  { %v1461_v47 = vpop.permute.xlu0 %1460 }
0x19d8   :  { %v1463_v40 = vadd.f32 %v1461_v47, %v1453_v39 }
0x19da   :  { %2593 = vtanh.f32 %v1463_v40 }
0x19e7   :  { %v2594_v42 = vpop.eup %2593 }
0x19e8   :  { %1466 = vrot.lane.b32.xlu1 %v2594_v42, %s2639_s0 }
0x1a5a   :  { %v1467_v43 = vpop.permute.xlu1 %1466 }
0x1a5b   :  { %v1469_v45 = vmul.f32 %v1467_v43, %v1451_v36 }
0x1a5d   :  { %v1471_v46 = vpack.c.bf16 %v1469_v45, %v1469_v45 }
0x1a5f   :  { %1473 = vrot.lane.b32.xlu0 %v1471_v46, %s2640_s2 }
0x1ad1   :  { %v1474_v48 = vpop.permute.xlu0 %1473 }
0x1ad2   :  { %2362 = vmatmul.mubr.msk.bf16.vlgmr.msra.gmra.mxu1 %vm353_vm1, %v1474_v48 }
0x1ad3   :  { %2366 = vmatpush3.bf16.msra.mxu1 %v3073_v0  ;;  %2369 = vmatprep.mubr.msk.bf16.mxu1 %vm2642_vm4, %v2641_v25 }
0x1ad4   :  { %2367 = vmatprep.subr.bf16.mxu1 %v2641_v25 }
0x1ad7   :  { %2368 = vmatpush3.bf16.msra.mxu1 %v3083_v5 }
0x1ad8   :  { %2381 = vmatprep.subr.bf16.mxu1 %v2641_v25 }
0x1b92   :  { %v1512_v31 = vpop.f32.mrf.mxu1 }
0x1b93   :  { %v1518_v4 = vadd.f32 %v1512_v31, %v1352_v50 }
0x1b94   :  { %v2363_v52 = vpop.f32.mrf.mxu1 }
0x1b95   :  { %2595 = vtanh.f32 %v1518_v4  ;;  %v1519_v8 = vmul.f32 0.5, %v1518_v4 }
0x1b96   :  { %v1515_v6 = vpop.f32.mrf.mxu1 }
0x1b97   :  { %2597 = vtanh.f32 %v1519_v8 }
0x1b98   :  { %v2364_v54 = vpop.f32.mrf.mxu1 }
0x1ba2   :  { %v2596_v7 = vpop.eup %2595 }
0x1ba3   :  { %1526 = vrot.lane.b32.xlu1 %v2596_v7, %s2639_s0 }
0x1ba4   :  { %v2598_v9 = vpop.eup %2597 }
0x1ba5   :  { %v1521_v10 = vmul.f32 0.5, %v2598_v9 }
0x1ba7   :  { %v1522_v12 = vadd.f32 0.5, %v1521_v10 }
0x1ba9   :  { %v1524_v51 = vmul.f32 %v1522_v12, %v1463_v40 }
0x1c15   :  { %v1527_v49 = vpop.permute.xlu1 %1526 }
0x1c16   :  { %v1529_v56 = vmul.f32 %v1527_v49, %v1522_v12 }
0x1c18   :  { %1531 = vrot.lane.b32.xlu0 %v1529_v56, %s2640_s2 }
0x1c8a   :  { %v1532_v57 = vpop.permute.xlu0 %1531 }
0x1c8b   :  { %v1534_v34 = vadd.f32 %v1532_v57, %v1524_v51 }
0x1c8d   :  { %2599 = vtanh.f32 %v1534_v34 }
0x1c9a   :  { %v2600_v59 = vpop.eup %2599 }
0x1c9b   :  { %1537 = vrot.lane.b32.xlu1 %v2600_v59, %s2639_s0 }
0x1d0d   :  { %v1538_v60 = vpop.permute.xlu1 %1537 }
0x1d0e   :  { %v1540_v61 = vmul.f32 %v1538_v60, %v1522_v12 }
0x1d10   :  { %v1542_v62 = vpack.c.bf16 %v1540_v61, %v1540_v61 }
0x1d12   :  { %1544 = vrot.lane.b32.xlu0 %v1542_v62, %s2640_s2 }
0x1d84   :  { %v1545_v55 = vpop.permute.xlu0 %1544 }
0x1d85   :  { %2370 = vmatmul.mubr.msk.bf16.vlgmr.msra.gmra.mxu1 %vm353_vm1, %v1545_v55 }
0x1d86   :  { %2382 = vmatpush3.bf16.msra.mxu1 %v3073_v0  ;;  %2385 = vmatprep.mubr.msk.bf16.mxu1 %vm2642_vm4, %v2641_v25 }
0x1d87   :  { %2383 = vmatprep.subr.bf16.mxu1 %v2641_v25 }
0x1d8a   :  { %2384 = vmatpush3.bf16.msra.mxu1 %v3083_v5 }
0x1d8b   :  { %2397 = vmatprep.subr.bf16.mxu1 %v2641_v25 }
0x1e45   :  { %v1583_v58 = vpop.f32.mrf.mxu1 }
0x1e46   :  { %v1589_v11 = vadd.f32 %v1583_v58, %v3068_v63 }
0x1e47   :  { %v2371_v13 = vpop.f32.mrf.mxu1 }
0x1e48   :  { %2601 = vtanh.f32 %v1589_v11  ;;  %v1590_v19 = vmul.f32 0.5, %v1589_v11 }
0x1e49   :  { %v1586_v16 = vpop.f32.mrf.mxu1 }
0x1e4a   :  { %2603 = vtanh.f32 %v1590_v19 }
0x1e4b   :  { %v2372_v15 = vpop.f32.mrf.mxu1 }
0x1e4c   :  { %v1368_v15 = vadd.f32 %v3065_v27, %v3152_v53 }
0x1e55   :  { %v2602_v17 = vpop.eup %2601 }
0x1e56   :  { %1597 = vrot.lane.b32.xlu1 %v2602_v17, %s2639_s0 }
0x1e57   :  { %v2604_v44 = vpop.eup %2603 }
0x1e58   :  { %v1592_v21 = vmul.f32 0.5, %v2604_v44 }
0x1e5a   :  { %v1593_v41 = vadd.f32 0.5, %v1592_v21 }
0x1e5c   :  { %v1595_v22 = vmul.f32 %v1593_v41, %v1534_v34 }
0x1ec8   :  { %v1598_v24 = vpop.permute.xlu1 %1597 }
0x1ec9   :  { %v1600_v26 = vmul.f32 %v1598_v24, %v1593_v41 }
0x1ecb   :  { %1602 = vrot.lane.b32.xlu0 %v1600_v26, %s2640_s2 }
0x1f3d   :  { %v1603_v28 = vpop.permute.xlu0 %1602 }
0x1f3e   :  { %v1605_v1 = vadd.f32 %v1603_v28, %v1595_v22 }
0x1f40   :  { %2605 = vtanh.f32 %v1605_v1 }
0x1f4d   :  { %v2606_v63 = vpop.eup %2605 }
0x1f4e   :  { %1608 = vrot.lane.b32.xlu1 %v2606_v63, %s2639_s0 }
0x1fc0   :  { %v1609_v30 = vpop.permute.xlu1 %1608 }
0x1fc1   :  { %v1611_v32 = vmul.f32 %v1609_v30, %v1593_v41 }
0x1fc3   :  { %v1613_v33 = vpack.c.bf16 %v1611_v32, %v1611_v32 }
0x1fc5   :  { %1615 = vrot.lane.b32.xlu0 %v1613_v33, %s2640_s2 }
0x2037   :  { %v1616_v2 = vpop.permute.xlu0 %1615 }
0x2038   :  { %2378 = vmatmul.mubr.msk.bf16.vlgmr.msra.gmra.mxu0 %vm353_vm1, %v1616_v2 }
0x2039   :  { %2390 = vmatpush3.bf16.msra.mxu0 %v3073_v0  ;;  %2393 = vmatprep.mubr.msk.bf16.mxu0 %vm2642_vm4, %v2641_v25 }
0x203a   :  { %2391 = vmatprep.subr.bf16.mxu0 %v2641_v25 }
0x203d   :  { %2392 = vmatpush3.bf16.msra.mxu0 %v3083_v5 }
0x203e   :  { %2405 = vmatprep.subr.bf16.mxu0 %v2641_v25 }
0x20f8   :  { %v1654_v35 = vpop.f32.mrf.mxu0 }
0x20f9   :  { %v1660_v37 = vadd.f32 %v1654_v35, %v3078_v3 }
0x20fa   :  { %v2379_v36 = vpop.f32.mrf.mxu0 }
0x20fb   :  { %2607 = vtanh.f32 %v1660_v37  ;;  %v1661_v47 = vmul.f32 0.5, %v1660_v37 }
0x20fc   :  { %v1657_v29 = vpop.f32.mrf.mxu0 }
0x20fd   :  { %2609 = vtanh.f32 %v1661_v47 }
0x20fe   :  { %v2380_v38 = vpop.f32.mrf.mxu0 }
0x2108   :  { %v2608_v39 = vpop.eup %2607 }
0x2109   :  { %1668 = vrot.lane.b32.xlu1 %v2608_v39, %s2639_s0 }
0x210a   :  { %v2610_v40 = vpop.eup %2609 }
0x210b   :  { %v1663_v42 = vmul.f32 0.5, %v2610_v40 }
0x210d   :  { %v1664_v43 = vadd.f32 0.5, %v1663_v42 }
0x210f   :  { %v1666_v48 = vmul.f32 %v1664_v43, %v1605_v1 }
0x217b   :  { %v1669_v45 = vpop.permute.xlu1 %1668 }
0x217c   :  { %v1671_v46 = vmul.f32 %v1669_v45, %v1664_v43 }
0x217e   :  { %1673 = vrot.lane.b32.xlu0 %v1671_v46, %s2640_s2 }
0x21f0   :  { %v1674_v50 = vpop.permute.xlu0 %1673 }
0x21f1   :  { %v1676_v31 = vadd.f32 %v1674_v50, %v1666_v48 }
0x21f3   :  { %2611 = vtanh.f32 %v1676_v31 }
0x2200   :  { %v2612_v3 = vpop.eup %2611 }
0x2201   :  { %1679 = vrot.lane.b32.xlu1 %v2612_v3, %s2639_s0 }
0x2273   :  { %v1680_v4 = vpop.permute.xlu1 %1679 }
0x2274   :  { %v1682_v52 = vmul.f32 %v1680_v4, %v1664_v43 }
0x2276   :  { %v1684_v6 = vpack.c.bf16 %v1682_v52, %v1682_v52 }
0x2278   :  { %1686 = vrot.lane.b32.xlu0 %v1684_v6, %s2640_s2 }
0x22ea   :  { %v1687_v54 = vpop.permute.xlu0 %1686 }
0x22eb   :  { %2386 = vmatmul.mubr.msk.bf16.vlgmr.msra.gmra.mxu1 %vm353_vm1, %v1687_v54 }
0x22ec   :  { %2398 = vmatpush3.bf16.msra.mxu1 %v3073_v0  ;;  %2401 = vmatprep.mubr.msk.bf16.mxu1 %vm2642_vm4, %v2641_v25 }
0x22ed   :  { %2399 = vmatprep.subr.bf16.mxu1 %v2641_v25 }
0x22f0   :  { %2400 = vmatpush3.bf16.msra.mxu1 %v3083_v5 }
0x22f1   :  { %2413 = vmatprep.subr.bf16.mxu1 %v2641_v25 }
0x23ab   :  { %v1725_v7 = vpop.f32.mrf.mxu1 }
0x23ac   :  { %v1731_v8 = vadd.f32 %v1725_v7, %v3093_v18 }
0x23ad   :  { %v2387_v9 = vpop.f32.mrf.mxu1 }
0x23ae   :  { %2613 = vtanh.f32 %v1731_v8  ;;  %v1732_v56 = vmul.f32 0.5, %v1731_v8 }
0x23af   :  { %v1728_v10 = vpop.f32.mrf.mxu1 }
0x23b0   :  { %2615 = vtanh.f32 %v1732_v56 }
0x23b1   :  { %v2388_v12 = vpop.f32.mrf.mxu1 }
0x23bb   :  { %v2614_v49 = vpop.eup %2613 }
0x23bc   :  { %1739 = vrot.lane.b32.xlu1 %v2614_v49, %s2639_s0 }
0x23bd   :  { %v2616_v51 = vpop.eup %2615 }
0x23be   :  { %v1734_v57 = vmul.f32 0.5, %v2616_v51 }
0x23c0   :  { %v1735_v34 = vadd.f32 0.5, %v1734_v57 }
0x23c2   :  { %v1737_v61 = vmul.f32 %v1735_v34, %v1676_v31 }
0x242e   :  { %v1740_v59 = vpop.permute.xlu1 %1739 }
0x242f   :  { %v1742_v60 = vmul.f32 %v1740_v59, %v1735_v34 }
0x2431   :  { %1744 = vrot.lane.b32.xlu0 %v1742_v60, %s2640_s2 }
0x24a3   :  { %v1745_v62 = vpop.permute.xlu0 %1744 }
0x24a4   :  { %v1747_v55 = vadd.f32 %v1745_v62, %v1737_v61 }
0x24a6   :  { %2617 = vtanh.f32 %v1747_v55 }
0x24b3   :  { %v2618_v18 = vpop.eup %2617 }
0x24b4   :  { %1750 = vrot.lane.b32.xlu1 %v2618_v18, %s2639_s0  ;;  %v2480_v18 = vld [vmem:[%s3255_s9] sm:$0xff]  }
0x2526   :  { %v1751_v58 = vpop.permute.xlu1 %1750 }
0x2527   :  { %v1753_v11 = vmul.f32 %v1751_v58, %v1735_v34 }
0x2529   :  { %v1755_v13 = vpack.c.bf16 %v1753_v11, %v1753_v11  ;;  %v2481_v11 = vld [vmem:[%s3258_s11 + $0x18] sm:$0xff]  }
0x252b   :  { %1757 = vrot.lane.b32.xlu0 %v1755_v13, %s2640_s2  ;;  %v2482_v13 = vld [vmem:[%s3258_s11 + $0x10] sm:$0xff]  }
0x259d   :  { %v1758_v16 = vpop.permute.xlu0 %1757 }
0x259e   :  { %2394 = vmatmul.mubr.msk.bf16.vlgmr.msra.gmra.mxu0 %vm353_vm1, %v1758_v16 }
0x259f   :  { %2406 = vmatpush3.bf16.msra.mxu0 %v3073_v0  ;;  %2409 = vmatprep.mubr.msk.bf16.mxu0 %vm2642_vm4, %v2641_v25 }
0x25a0   :  { %2407 = vmatprep.subr.bf16.mxu0 %v2641_v25 }
0x25a3   :  { %2408 = vmatpush3.bf16.msra.mxu0 %v3083_v5 }
0x25a4   :  { %2421 = vmatprep.subr.bf16.mxu0 %v2641_v25 }
0x265e   :  { %v1796_v17 = vpop.f32.mrf.mxu0 }
0x265f   :  { %v1802_v19 = vadd.f32 %v1796_v17, %v1368_v15 }
0x2660   :  { %v2395_v44 = vpop.f32.mrf.mxu0 }
0x2661   :  { %2619 = vtanh.f32 %v1802_v19  ;;  %v1803_v0 = vmul.f32 0.5, %v1802_v19  ;;  %v2483_v44 = vld [vmem:[%s3258_s11 + $0x8] sm:$0xff]  }
0x2662   :  { %v1799_v21 = vpop.f32.mrf.mxu0 }
0x2663   :  { %2621 = vtanh.f32 %v1803_v0  ;;  %v2484_v21 = vld [vmem:[%s3258_s11] sm:$0xff]  }
0x2664   :  { %v2396_v41 = vpop.f32.mrf.mxu0  ;;  %v2251_v0 = vld [vmem:[%s3260_s10] ss:$0 sm:$0xff] }
0x2665   :  { %v2485_v41 = vld [vmem:[%s3259_s13 + $0x8] sm:$0xff]  }
0x266e   :  { %v2620_v24 = vpop.eup %2619 }
0x266f   :  { %1810 = vrot.lane.b32.xlu1 %v2620_v24, %s2639_s0 }
0x2670   :  { %v2622_v26 = vpop.eup %2621 }
0x2671   :  { %v1805_v22 = vmul.f32 0.5, %v2622_v26 }
0x2673   :  { %v1806_v28 = vadd.f32 0.5, %v1805_v22 }
0x2675   :  { %v1808_v63 = vmul.f32 %v1806_v28, %v1747_v55 }
0x26e1   :  { %v1811_v5 = vpop.permute.xlu1 %1810 }
0x26e2   :  { %v1813_v1 = vmul.f32 %v1811_v5, %v1806_v28 }
0x26e4   :  { %1815 = vrot.lane.b32.xlu0 %v1813_v1, %s2640_s2 }
0x2756   :  { %v1816_v27 = vpop.permute.xlu0 %1815 }
0x2757   :  { %v1818_v30 = vadd.f32 %v1816_v27, %v1808_v63 }
0x2759   :  { %2623 = vtanh.f32 %v1818_v30 }
0x2766   :  { %v2624_v32 = vpop.eup %2623 }
0x2767   :  { %1821 = vrot.lane.b32.xlu1 %v2624_v32, %s2639_s0 }
0x27d9   :  { %v1822_v33 = vpop.permute.xlu1 %1821 }
0x27da   :  { %v1824_v2 = vmul.f32 %v1822_v33, %v1806_v28 }
0x27dc   :  { %v1826_v53 = vpack.c.bf16 %v1824_v2, %v1824_v2 }
0x27de   :  { %1828 = vrot.lane.b32.xlu0 %v1826_v53, %s2640_s2 }
0x2850   :  { %v1829_v35 = vpop.permute.xlu0 %1828 }
0x2851   :  { %2402 = vmatmul.mubr.msk.bf16.vlgmr.msra.gmra.mxu1 %vm353_vm1, %v1829_v35 }
0x2852   :  { %2417 = vmatprep.mubr.msk.bf16.mxu1 %vm2642_vm4, %v2641_v25 }
0x2911   :  { %v1867_v37 = vpop.f32.mrf.mxu1 }
0x2912   :  { %v1873_v36 = vadd.f32 %v1867_v37, %v3090_v14 }
0x2913   :  { %v2403_v29 = vpop.f32.mrf.mxu1 }
0x2914   :  { %2625 = vtanh.f32 %v1873_v36  ;;  %v1874_v40 = vmul.f32 0.5, %v1873_v36 }
0x2915   :  { %v1870_v38 = vpop.f32.mrf.mxu1 }
0x2916   :  { %2627 = vtanh.f32 %v1874_v40 }
0x2917   :  { %v2404_v39 = vpop.f32.mrf.mxu1 }
0x2921   :  { %v2626_v47 = vpop.eup %2625 }
0x2922   :  { %1881 = vrot.lane.b32.xlu1 %v2626_v47, %s2639_s0 }
0x2923   :  { %v2628_v42 = vpop.eup %2627 }
0x2924   :  { %v1876_v43 = vmul.f32 0.5, %v2628_v42 }
0x2926   :  { %v1877_v45 = vadd.f32 0.5, %v1876_v43 }
0x2928   :  { %v1879_v50 = vmul.f32 %v1877_v45, %v1818_v30  ;;  %v2486_v30 = vld [vmem:[%s3259_s13] sm:$0xff]  }
0x2994   :  { %v1882_v46 = vpop.permute.xlu1 %1881 }
0x2995   :  { %v1884_v48 = vmul.f32 %v1882_v46, %v1877_v45 }
0x2997   :  { %1886 = vrot.lane.b32.xlu0 %v1884_v48, %s2640_s2 }
0x2a09   :  { %v1887_v31 = vpop.permute.xlu0 %1886 }
0x2a0a   :  { %v1889_v3 = vadd.f32 %v1887_v31, %v1879_v50 }
0x2a0c   :  { %2629 = vtanh.f32 %v1889_v3 }
0x2a19   :  { %v2630_v14 = vpop.eup %2629 }
0x2a1a   :  { %1892 = vrot.lane.b32.xlu1 %v2630_v14, %s2639_s0 }
0x2a8c   :  { %v1893_v4 = vpop.permute.xlu1 %1892 }
0x2a8d   :  { %v1895_v52 = vmul.f32 %v1893_v4, %v1877_v45 }
0x2a8f   :  { %v1897_v6 = vpack.c.bf16 %v1895_v52, %v1895_v52 }
0x2a91   :  { %1899 = vrot.lane.b32.xlu0 %v1897_v6, %s2640_s2 }
0x2b03   :  { %v1900_v54 = vpop.permute.xlu0 %1899 }
0x2b04   :  { %2410 = vmatmul.mubr.msk.bf16.vlgmr.msra.gmra.mxu0 %vm353_vm1, %v1900_v54 }
0x2b05   :  { %2429 = vmatprep.mubr.msk.bf16.mxu0 %vm2642_vm4, %v2641_v25  ;;  %2422 = vmatpush3.bf16.msra.mxu0 %v2481_v11 }
0x2b06   :  { %2423 = vmatprep.subr.bf16.mxu0 %v2641_v25 }
0x2b09   :  { %2424 = vmatpush3.bf16.msra.mxu0 %v2482_v13 }
0x2b0a   :  { %2425 = vmatprep.subr.bf16.mxu0 %v2641_v25 }
0x2b0d   :  { %2426 = vmatpush3.bf16.msra.mxu0 %v2483_v44 }
0x2b0e   :  { %2427 = vmatprep.subr.bf16.mxu0 %v2641_v25 }
0x2b11   :  { %2428 = vmatpush3.bf16.msra.mxu0 %v2484_v21 }
0x2bc4   :  { %v1938_v7 = vpop.f32.mrf.mxu0 }
0x2bc5   :  { %v1944_v8 = vadd.f32 %v1938_v7, %v3096_v20  ;;  %v2479_v20 = vld [vmem:[%s3255_s9 + $0x8] sm:$0xff]  }
0x2bc6   :  { %v2411_v9 = vpop.f32.mrf.mxu0  ;;  %2414 = vmatpush3.bf16.msra.mxu1 %v2479_v20 }
0x2bc7   :  { %2631 = vtanh.f32 %v1944_v8  ;;  %v1945_v56 = vmul.f32 0.5, %v1944_v8  ;;  %2415 = vmatprep.subr.bf16.mxu1 %v2641_v25 }
0x2bc8   :  { %v1941_v10 = vpop.f32.mrf.mxu0 }
0x2bc9   :  { %2633 = vtanh.f32 %v1945_v56 }
0x2bca   :  { %v2412_v12 = vpop.f32.mrf.mxu0  ;;  %2416 = vmatpush3.bf16.msra.mxu1 %v2480_v18 }
0x2bcb   :  { %2433 = vmatprep.subr.bf16.mxu1 %v2641_v25 }
0x2bd4   :  { %v2632_v49 = vpop.eup %2631 }
0x2bd5   :  { %1952 = vrot.lane.b32.xlu1 %v2632_v49, %s2639_s0 }
0x2bd6   :  { %v2634_v51 = vpop.eup %2633 }
0x2bd7   :  { %v1947_v57 = vmul.f32 0.5, %v2634_v51 }
0x2bd9   :  { %v1948_v34 = vadd.f32 0.5, %v1947_v57 }
0x2bdb   :  { %v1950_v61 = vmul.f32 %v1948_v34, %v1889_v3 }
0x2c47   :  { %v1953_v59 = vpop.permute.xlu1 %1952 }
0x2c48   :  { %v1955_v60 = vmul.f32 %v1953_v59, %v1948_v34 }
0x2c4a   :  { %1957 = vrot.lane.b32.xlu0 %v1955_v60, %s2640_s2 }
0x2cbc   :  { %v1958_v62 = vpop.permute.xlu0 %1957 }
0x2cbd   :  { %v1960_v55 = vadd.f32 %v1958_v62, %v1950_v61 }
0x2cbf   :  { %2635 = vtanh.f32 %v1960_v55 }
0x2ccc   :  { %v2636_v58 = vpop.eup %2635 }
0x2ccd   :  { %1963 = vrot.lane.b32.xlu1 %v2636_v58, %s2639_s0 }
0x2d3f   :  { %v1964_v16 = vpop.permute.xlu1 %1963 }
0x2d40   :  { %v1966_v15 = vmul.f32 %v1964_v16, %v1948_v34 }
0x2d42   :  { %v1971_v17 = vpack.c.bf16 %v1966_v15, %v1966_v15 }
0x2d44   :  { %1973 = vrot.lane.b32.xlu0 %v1971_v17, %s2640_s2 }
0x2db6   :  { %v1974_v19 = vpop.permute.xlu0 %1973 }
0x2db7   :  { %2418 = vmatmul.mubr.msk.bf16.vlgmr.msra.gmra.mxu1 %vm353_vm1, %v1974_v19 }
0x2db8   :  { %2437 = vmatprep.mubr.msk.bf16.mxu1 %vm2642_vm4, %v2641_v25  ;;  %2434 = vmatpush3.bf16.msra.mxu1 %v2485_v41 }
0x2db9   :  { %2435 = vmatprep.subr.bf16.mxu1 %v2641_v25  ;;  %v20_v25 = vstv %s3261_s14 }
0x2dba   :  { %21 = vst [vmem:[#allocation5] sm:$0x1] %v20_v25 }
0x2dbc   :  { %2436 = vmatpush3.bf16.msra.mxu1 %v2486_v30 }
0x2dc1   :  { %v2258_v29 = vld [vmem:[#allocation5] ss:$0 sm:$0xff] }
0x2e77   :  { %v2024_v24 = vpop.f32.mrf.mxu1 }
0x2e78   :  { %v2025_v26 = vadd.f32 %v2024_v24, %v3113_v23  ;;  %v2252_v23 = vld [vmem:[%s3262_s12] ss:$0 sm:$0xff] }
0x2e79   :  { %v2419_v22 = vpop.f32.mrf.mxu1 }
0x2e7a   :  { %v2037_v28 = vadd.f32 %v2251_v0, %v2025_v26 }
0x2e7b   :  { %v2027_v5 = vpop.f32.mrf.mxu1 }
0x2e7c   :  { %v2038_v1 = vmax.f32 %v2037_v28, 0.0 }
0x2e7d   :  { %v2420_v63 = vpop.f32.mrf.mxu1 }
0x2e7e   :  { %v2047_v27 = vpack.c.bf16 %v2038_v1, %v2038_v1 }
0x2e80   :  { %2430 = vmatmul.mubr.msk.bf16.vlgmr.msra.gmra.mxu0 %vm258_vm3, %v2047_v27 }
0x2f40   :  { %v2116_v32 = vpop.f32.mrf.mxu0 }
0x2f41   :  { %v2117_v33 = vadd.f32 %v2252_v23, %v2116_v32 }
0x2f42   :  { %v2431_v2 = vpop.f32.mrf.mxu0 }
0x2f43   :  { %v2122_v53 = vmax.f32 %v2117_v33, 0.0 }
0x2f44   :  { %v2119_v35 = vpop.f32.mrf.mxu0 }
0x2f45   :  { %v2127_v37 = vpack.c.bf16 %v2122_v53, %v2122_v53 }
0x2f46   :  { %v2432_v36 = vpop.f32.mrf.mxu0 }
0x2f47   :  { %2438 = vmatmul.mubr.msk.bf16.vlgmr.msra.gmra.mxu1 %vm353_vm1, %v2127_v37 }
0x3007   :  { %v2184_v38 = vpop.f32.mrf.mxu1 }
0x3008   :  { %v2185_v39 = vadd.f32 %v2258_v29, %v2184_v38 }
0x3009   :  { %v2439_v47 = vpop.f32.mrf.mxu1 }
0x300a   :  { %2191 = vst.msk [vmem:[%s3263_s15] sm:$0xff] %vm2190_vm5, %v2185_v39 }
0x300b   :  { %v2187_v40 = vpop.f32.mrf.mxu1 }
0x300d   :  { %v2440_v42 = vpop.f32.mrf.mxu1 }

</bundles_post_ra>
